<compile_context>
chip_gen: v5e
topology: v5e:2x2
jax: 0.10.0
libtpu: 0.0.40
codegen_flags: <defaults>
</compile_context>

<pallas_src>
import functools

import jax
import jax.numpy as jnp
from jax.experimental import pallas as pl
from jax.experimental.pallas import tpu as pltpu


def _mha_kernel(q_ref, k_ref, v_ref,
                wq_ref, bq_ref, wk_ref, bk_ref, wv_ref, bv_ref,
                wo_ref, bo_ref,
                *out_refs,
                num_heads, head_dim, scaling, compute_dtype, need_weights):
    cdt = compute_dtype
    _, tn, L, E = q_ref.shape
    S = k_ref.shape[2]
    o_ref = out_refs[0]
    ow_ref = out_refs[1] if need_weights else None

    # Flattened (TN*T, E) operands: large MXU M-dim for the projection GEMMs.
    xq = q_ref[0].reshape(tn * L, E).astype(cdt)
    xk = k_ref[0].reshape(tn * S, E).astype(cdt)
    xv = v_ref[0].reshape(tn * S, E).astype(cdt)

    # Weights/biases already arrive in the compute dtype from the wrapper.
    wq = wq_ref[0]
    wk = wk_ref[0]
    wv = wv_ref[0]
    wo = wo_ref[0]
    bq = bq_ref[0].astype(jnp.float32)
    bk = bk_ref[0].astype(jnp.float32)
    bv = bv_ref[0].astype(jnp.float32)
    bo = bo_ref[0].astype(jnp.float32)

    # Q/K/V projections with f32 accumulation; bias + query scaling in f32
    # (matches the module: scaling applied after the linear), then ONE cast to
    # the compute dtype so only one copy stays live across the head loop.
    q = ((jnp.dot(xq, wq, preferred_element_type=jnp.float32) + bq) * scaling
         ).astype(cdt).reshape(tn, L, E)
    k = (jnp.dot(xk, wk, preferred_element_type=jnp.float32) + bk
         ).astype(cdt).reshape(tn, S, E)
    v = (jnp.dot(xv, wv, preferred_element_type=jnp.float32) + bv
         ).astype(cdt).reshape(tn, S, E)

    # approx reciprocal => attention-weight rows sum to 1 only to ~1e-3 rel;
    # exact division is used on the f32 (verification) path.
    approx = jnp.dtype(cdt) != jnp.dtype(jnp.float32)
    w_sum = jnp.zeros((tn, L, S), jnp.float32) if need_weights else None
    ctx_heads = []

    # Static loop over heads (num_heads is a small compile-time constant).
    # TODO(synk): for large num_heads use lax.fori_loop carrying (w_sum, ctx)
    # to bound live ranges / unrolled code size.
    for h in range(num_heads):
        sl = slice(h * head_dim, (h + 1) * head_dim)
        qh = q[:, :, sl]                                  # (TN, L, hd)
        kh = k[:, :, sl]                                  # (TN, S, hd)
        vh = v[:, :, sl]                                  # (TN, S, hd)

        s = jnp.einsum('nld,nsd->nls', qh, kh,
                       preferred_element_type=jnp.float32)        # (TN, L, S)
        s = s - jnp.max(s, axis=-1, keepdims=True)
        p = jnp.exp(s)                                            # f32 softmax
        inv = pl.reciprocal(jnp.sum(p, axis=-1, keepdims=True), approx=approx)
        p = p * inv
        if need_weights:
            w_sum = w_sum + p

        ctx_heads.append(
            jnp.einsum('nls,nsd->nld', p.astype(cdt), vh,
                       preferred_element_type=jnp.float32).astype(cdt))

    # Hoisted output projection: a single GEMM with contraction depth K = E
    # (full MXU depth) instead of num_heads GEMMs with K = head_dim.
    ctx = jnp.concatenate(ctx_heads, axis=-1).reshape(tn * L, E)
    out = jnp.dot(ctx, wo, preferred_element_type=jnp.float32) + bo
    o_ref[0] = out.reshape(tn, L, E).astype(o_ref.dtype)
    if need_weights:
        ow_ref[0] = (w_sum * (1.0 / num_heads)).astype(ow_ref.dtype)


def _vmem_target():
    """Generation-aware VMEM target (~48 MiB on v7x, ~96 MiB on v5e/v6e)."""
    try:
        cap = int(pltpu.get_tpu_info().vmem_capacity_bytes)
    except Exception:
        cap = 64 * 1024 * 1024          # conservative fallback (v7x-sized)
    return max(32 * 1024 * 1024, min(int(cap * 0.75), 100 * 1024 * 1024))


def _pick_tn(N, L, S, E, *, B, in_bytes, c_bytes, o_bytes, ow_bytes, w_bytes,
             need_weights, vmem_budget):
    """Largest divisor of N whose per-step VMEM footprint fits the budget.

    Counts double-buffered q/k/v input tiles, double-buffered output tiles,
    resident (double-buffered) weights/biases, and live intermediates
    (f32 projections + compute-dtype copies, per-head logits/probs, w_sum,
    context and f32 output accumulator)."""
    weight_bytes = 2 * (4 * E * E + 4 * E) * w_bytes      # 2x-buffered W + b
    budget = max(vmem_budget - weight_bytes, 1 << 20)

    io_per = 2 * ((L + 2 * S) * E * in_bytes              # q/k/v in tiles
                  + L * E * o_bytes                       # o out tile
                  + (L * S * ow_bytes if need_weights else 0))
    act_per = ((L + 2 * S) * E * (4 + c_bytes)            # f32 proj + cdt copy
               + (3 if need_weights else 2) * L * S * 4   # s, p (+ w_sum)
               + L * E * (c_bytes + 4))                   # ctx + f32 out
    per_sample = io_per + act_per

    min_steps = min(2, B * N)     # keep both v7x TensorCores busy if possible
    best = 1
    for t in range(1, N + 1):
        if N % t:
            continue
        if t * per_sample > budget:
            continue
        if B * (N // t) < min_steps:
            continue
        best = t
    return best


def multihead_attention(query, key, value, params, *, num_heads,
                        compute_dtype=jnp.bfloat16,
                        weights_dtype=jnp.float32,
                        need_weights=True):
    """query: [B, N, L, E], key/value: [B, N, S, E].  params: per-model weights."""
    B, N, L, E = query.shape
    S = key.shape[2]
    assert E % num_heads == 0
    head_dim = E // num_heads
    scaling = float(head_dim) ** (-0.5)
    cdt = compute_dtype

    # Pad L to a sublane multiple so the in-kernel (tn,L,E)->(tn*L,E) reshape is
    # layout-free; padded query rows are sliced off at the end.
    Lp = ((L + 7) // 8) * 8
    q_in = query if Lp == L else jnp.pad(
        query, ((0, 0), (0, 0), (0, Lp - L), (0, 0)))
    # TODO(synk): padding S/E to lane multiples requires in-kernel key masking;
    # not done here (toy and typical shapes already satisfy it or stay correct).

    # Pass weights/biases in the compute dtype: halves resident weight VMEM and
    # the weight DMA bytes on b-changes (kernel casts to bf16 anyway).
    wq = params["wq"].astype(cdt); bq = params["bq"].astype(cdt)
    wk = params["wk"].astype(cdt); bk = params["bk"].astype(cdt)
    wv = params["wv"].astype(cdt); bv = params["bv"].astype(cdt)
    wo = params["wo"].astype(cdt); bo = params["bo"].astype(cdt)

    vmem_limit = _vmem_target()
    itemsize = lambda dt: jnp.dtype(dt).itemsize
    tn = _pick_tn(
        N, Lp, S, E, B=B,
        in_bytes=itemsize(query.dtype), c_bytes=itemsize(cdt),
        o_bytes=itemsize(query.dtype),
        ow_bytes=itemsize(weights_dtype) if need_weights else 0,
        w_bytes=itemsize(cdt), need_weights=need_weights,
        vmem_budget=vmem_limit)

    kernel = functools.partial(
        _mha_kernel, num_heads=num_heads, head_dim=head_dim, scaling=scaling,
        compute_dtype=cdt, need_weights=need_weights)

    seq_spec = lambda T: pl.BlockSpec((1, tn, T, E), lambda b, n: (b, n, 0, 0))
    w_spec = pl.BlockSpec((1, E, E), lambda b, n: (b, 0, 0))
    b_spec = pl.BlockSpec((1, 1, E), lambda b, n: (b, 0, 0))

    o_spec = pl.BlockSpec((1, tn, Lp, E), lambda b, n: (b, n, 0, 0))
    o_shape = jax.ShapeDtypeStruct((B, N, Lp, E), query.dtype)
    if need_weights:
        out_shape = (o_shape, jax.ShapeDtypeStruct((B, N, Lp, S), weights_dtype))
        out_specs = [o_spec, pl.BlockSpec((1, tn, Lp, S), lambda b, n: (b, n, 0, 0))]
    else:
        out_shape = o_shape
        out_specs = o_spec

    res = pl.pallas_call(
        kernel,
        out_shape=out_shape,
        grid_spec=pltpu.PrefetchScalarGridSpec(
            num_scalar_prefetch=0,
            grid=(B, N // tn),
            in_specs=[
                seq_spec(Lp), seq_spec(S), seq_spec(S),
                w_spec, b_spec,    # q
                w_spec, b_spec,    # k
                w_spec, b_spec,    # v
                w_spec, b_spec,    # o
            ],
            out_specs=out_specs,
        ),
        compiler_params=pltpu.CompilerParams(
            dimension_semantics=("parallel", "parallel"),
            vmem_limit_bytes=vmem_limit),
    )(q_in, key, value, wq, bq, wk, bk, wv, bv, wo, bo)

    if need_weights:
        o, ow = res
        return o[:, :, :L, :], ow[:, :, :L, :]
    return res[:, :, :L, :], None


def _reference(query, key, value, params, *, num_heads):
    """Plain-JAX reference mirroring the PyTorch module (B > 0 path)."""
    B, N, L, E = query.shape
    S = key.shape[2]
    hd = E // num_heads
    scaling = float(hd) ** (-0.5)

    def proj(x, w, b):  # x: [B, N*T, E], w: [B, E, E], b: [B, 1, E]
        return jnp.einsum("bte,bef->btf", x, w) + b

    q = proj(query.reshape(B, N * L, E), params["wq"], params["bq"])
    k = proj(key.reshape(B, N * S, E), params["wk"], params["bk"])
    v = proj(value.reshape(B, N * S, E), params["wv"], params["bv"])

    bsz = B * N
    q = (q.reshape(bsz, L, E) * scaling).reshape(bsz, L, num_heads, hd)
    q = q.transpose(0, 2, 1, 3).reshape(bsz * num_heads, L, hd)
    k = k.reshape(bsz, S, num_heads, hd).transpose(0, 2, 1, 3)
    k = k.reshape(bsz * num_heads, S, hd)
    v = v.reshape(bsz, S, num_heads, hd).transpose(0, 2, 1, 3)
    v = v.reshape(bsz * num_heads, S, hd)

    logits = jnp.einsum("zld,zsd->zls", q, k)
    p = jax.nn.softmax(logits, axis=-1)
    o = jnp.einsum("zls,zsd->zld", p, v)
    o = o.reshape(B, N, num_heads, L, hd).transpose(0, 1, 3, 2, 4)
    o = o.reshape(B, N * L, E)
    o = jnp.einsum("bte,bef->btf", o, params["wo"]) + params["bo"]
    o = o.reshape(B, N, L, E)

    ow = p.reshape(bsz, num_heads, L, S).sum(axis=1) / num_heads
    ow = ow.reshape(B, N, L, S)
    return o, ow


def init_params(key, B, E):
    """Deterministic synthetic init (xavier-uniform-like scale)."""
    ks = jax.random.split(key, 4)
    bound = (6.0 / (E + E)) ** 0.5
    mk_w = lambda k: jax.random.uniform(k, (B, E, E), jnp.float32, -bound, bound)
    return {
        "wq": mk_w(ks[0]), "bq": jnp.zeros((B, 1, E), jnp.float32),
        "wk": mk_w(ks[1]), "bk": jnp.zeros((B, 1, E), jnp.float32),
        "wv": mk_w(ks[2]), "bv": jnp.zeros((B, 1, E), jnp.float32),
        "wo": mk_w(ks[3]),
        "bo": jnp.linspace(-0.01, 0.01, B * E, dtype=jnp.float32).reshape(B, 1, E),
    }


if __name__ == "__main__":
    B, N, L, S, E, NUM_HEADS = 2, 2, 8, 8, 32, 4

    root = jax.random.PRNGKey(0)
    kq, kk, kv, kp = jax.random.split(root, 4)
    query = jax.random.normal(kq, (B, N, L, E), jnp.float32)
    key_ = jax.random.normal(kk, (B, N, S, E), jnp.float32)
    value = jax.random.normal(kv, (B, N, S, E), jnp.float32)
    params = init_params(kp, B, E)

    # Production path: bf16 weights & matmul operands (f32 accumulation),
    # bf16 attention-weights output.
    o_bf, ow_bf = multihead_attention(query, key_, value, params,
                                      num_heads=NUM_HEADS,
                                      compute_dtype=jnp.bfloat16,
                                      weights_dtype=jnp.bfloat16)
    # Exact f32 path for a tight numerical check.
    o_f32, ow_f32 = multihead_attention(query, key_, value, params,
                                        num_heads=NUM_HEADS,
                                        compute_dtype=jnp.float32,
                                        weights_dtype=jnp.float32)
    # need_weights=False path (skips the o_weights compute and HBM writeback).
    o_nw, ow_nw = multihead_attention(query, key_, value, params,
                                      num_heads=NUM_HEADS,
                                      compute_dtype=jnp.bfloat16,
                                      need_weights=False)
    jax.block_until_ready((o_bf, ow_bf, o_f32, ow_f32, o_nw))

    o_ref, ow_ref = _reference(query, key_, value, params, num_heads=NUM_HEADS)
    assert o_bf.shape == (B, N, L, E) and ow_bf.shape == (B, N, L, S)
    assert ow_nw is None

    assert jnp.allclose(o_f32, o_ref, rtol=1e-4, atol=1e-4)
    assert jnp.allclose(ow_f32, ow_ref, rtol=1e-4, atol=1e-4)
    assert jnp.allclose(o_bf.astype(jnp.float32), o_ref, rtol=5e-2, atol=5e-2)
    assert jnp.allclose(ow_bf.astype(jnp.float32), ow_ref, rtol=5e-2, atol=5e-2)
    assert jnp.allclose(o_nw.astype(jnp.float32), o_ref, rtol=5e-2, atol=5e-2)

    print("KERNEL_OK")
</pallas_src>

<mosaic_0001>
module attributes {stable_mosaic.version = 11 : i64} {
  func.func @_mha_kernel(%arg0: i32, %arg1: i32, %arg2: memref<1x2x8x32xf32, #tpu.memory_space<vmem>>, %arg3: memref<1x2x8x32xf32, #tpu.memory_space<vmem>>, %arg4: memref<1x2x8x32xf32, #tpu.memory_space<vmem>>, %arg5: memref<1x32x32xbf16, #tpu.memory_space<vmem>>, %arg6: memref<1x1x32xbf16, #tpu.memory_space<vmem>>, %arg7: memref<1x32x32xbf16, #tpu.memory_space<vmem>>, %arg8: memref<1x1x32xbf16, #tpu.memory_space<vmem>>, %arg9: memref<1x32x32xbf16, #tpu.memory_space<vmem>>, %arg10: memref<1x1x32xbf16, #tpu.memory_space<vmem>>, %arg11: memref<1x32x32xbf16, #tpu.memory_space<vmem>>, %arg12: memref<1x1x32xbf16, #tpu.memory_space<vmem>>, %arg13: memref<1x2x8x32xf32, #tpu.memory_space<vmem>>, %arg14: memref<1x2x8x8xbf16, #tpu.memory_space<vmem>>) attributes {dimension_semantics = [#tpu.dimension_semantics<parallel>, #tpu.dimension_semantics<parallel>], iteration_bounds = array<i64: 2, 1>, scalar_prefetch = 0 : i64, scratch_operands = 0 : i64, tpu.core_type = #tpu.core_type<tc>, window_params = [{transform_indices = @transform_0, window_bounds = array<i64: 1, 2, 8, 32>}, {transform_indices = @transform_1, window_bounds = array<i64: 1, 2, 8, 32>}, {transform_indices = @transform_2, window_bounds = array<i64: 1, 2, 8, 32>}, {transform_indices = @transform_3, window_bounds = array<i64: 1, 32, 32>}, {transform_indices = @transform_4, window_bounds = array<i64: 1, 1, 32>}, {transform_indices = @transform_5, window_bounds = array<i64: 1, 32, 32>}, {transform_indices = @transform_6, window_bounds = array<i64: 1, 1, 32>}, {transform_indices = @transform_7, window_bounds = array<i64: 1, 32, 32>}, {transform_indices = @transform_8, window_bounds = array<i64: 1, 1, 32>}, {transform_indices = @transform_9, window_bounds = array<i64: 1, 32, 32>}, {transform_indices = @transform_10, window_bounds = array<i64: 1, 1, 32>}, {transform_indices = @transform_11, window_bounds = array<i64: 1, 2, 8, 32>}, {transform_indices = @transform_12, window_bounds = array<i64: 1, 2, 8, 8>}]} {
    %c0 = arith.constant 0 : index
    %c0_0 = arith.constant 0 : index
    %c0_1 = arith.constant 0 : index
    %c0_2 = arith.constant 0 : index
    %0 = vector.load %arg2[%c0, %c0_0, %c0_1, %c0_2] : memref<1x2x8x32xf32, #tpu.memory_space<vmem>>, vector<1x2x8x32xf32>
    %1 = vector.shape_cast %0 : vector<1x2x8x32xf32> to vector<2x8x32xf32>
    %2 = vector.shape_cast %1 : vector<2x8x32xf32> to vector<16x32xf32>
    %3 = arith.truncf %2 : vector<16x32xf32> to vector<16x32xbf16>
    %c0_3 = arith.constant 0 : index
    %c0_4 = arith.constant 0 : index
    %c0_5 = arith.constant 0 : index
    %c0_6 = arith.constant 0 : index
    %4 = vector.load %arg3[%c0_3, %c0_4, %c0_5, %c0_6] : memref<1x2x8x32xf32, #tpu.memory_space<vmem>>, vector<1x2x8x32xf32>
    %5 = vector.shape_cast %4 : vector<1x2x8x32xf32> to vector<2x8x32xf32>
    %6 = vector.shape_cast %5 : vector<2x8x32xf32> to vector<16x32xf32>
    %7 = arith.truncf %6 : vector<16x32xf32> to vector<16x32xbf16>
    %c0_7 = arith.constant 0 : index
    %c0_8 = arith.constant 0 : index
    %c0_9 = arith.constant 0 : index
    %c0_10 = arith.constant 0 : index
    %8 = vector.load %arg4[%c0_7, %c0_8, %c0_9, %c0_10] : memref<1x2x8x32xf32, #tpu.memory_space<vmem>>, vector<1x2x8x32xf32>
    %9 = vector.shape_cast %8 : vector<1x2x8x32xf32> to vector<2x8x32xf32>
    %10 = vector.shape_cast %9 : vector<2x8x32xf32> to vector<16x32xf32>
    %11 = arith.truncf %10 : vector<16x32xf32> to vector<16x32xbf16>
    %c0_11 = arith.constant 0 : index
    %c0_12 = arith.constant 0 : index
    %c0_13 = arith.constant 0 : index
    %12 = vector.load %arg5[%c0_11, %c0_12, %c0_13] : memref<1x32x32xbf16, #tpu.memory_space<vmem>>, vector<1x32x32xbf16>
    %13 = vector.shape_cast %12 : vector<1x32x32xbf16> to vector<32x32xbf16>
    %c0_14 = arith.constant 0 : index
    %c0_15 = arith.constant 0 : index
    %c0_16 = arith.constant 0 : index
    %14 = vector.load %arg7[%c0_14, %c0_15, %c0_16] : memref<1x32x32xbf16, #tpu.memory_space<vmem>>, vector<1x32x32xbf16>
    %15 = vector.shape_cast %14 : vector<1x32x32xbf16> to vector<32x32xbf16>
    %c0_17 = arith.constant 0 : index
    %c0_18 = arith.constant 0 : index
    %c0_19 = arith.constant 0 : index
    %16 = vector.load %arg9[%c0_17, %c0_18, %c0_19] : memref<1x32x32xbf16, #tpu.memory_space<vmem>>, vector<1x32x32xbf16>
    %17 = vector.shape_cast %16 : vector<1x32x32xbf16> to vector<32x32xbf16>
    %c0_20 = arith.constant 0 : index
    %c0_21 = arith.constant 0 : index
    %c0_22 = arith.constant 0 : index
    %18 = vector.load %arg11[%c0_20, %c0_21, %c0_22] : memref<1x32x32xbf16, #tpu.memory_space<vmem>>, vector<1x32x32xbf16>
    %19 = vector.shape_cast %18 : vector<1x32x32xbf16> to vector<32x32xbf16>
    %c0_23 = arith.constant 0 : index
    %c0_24 = arith.constant 0 : index
    %c0_25 = arith.constant 0 : index
    %20 = vector.load %arg6[%c0_23, %c0_24, %c0_25] : memref<1x1x32xbf16, #tpu.memory_space<vmem>>, vector<1x1x32xbf16>
    %21 = vector.shape_cast %20 : vector<1x1x32xbf16> to vector<1x32xbf16>
    %22 = arith.extf %21 : vector<1x32xbf16> to vector<1x32xf32>
    %c0_26 = arith.constant 0 : index
    %c0_27 = arith.constant 0 : index
    %c0_28 = arith.constant 0 : index
    %23 = vector.load %arg8[%c0_26, %c0_27, %c0_28] : memref<1x1x32xbf16, #tpu.memory_space<vmem>>, vector<1x1x32xbf16>
    %24 = vector.shape_cast %23 : vector<1x1x32xbf16> to vector<1x32xbf16>
    %25 = arith.extf %24 : vector<1x32xbf16> to vector<1x32xf32>
    %c0_29 = arith.constant 0 : index
    %c0_30 = arith.constant 0 : index
    %c0_31 = arith.constant 0 : index
    %26 = vector.load %arg10[%c0_29, %c0_30, %c0_31] : memref<1x1x32xbf16, #tpu.memory_space<vmem>>, vector<1x1x32xbf16>
    %27 = vector.shape_cast %26 : vector<1x1x32xbf16> to vector<1x32xbf16>
    %28 = arith.extf %27 : vector<1x32xbf16> to vector<1x32xf32>
    %c0_32 = arith.constant 0 : index
    %c0_33 = arith.constant 0 : index
    %c0_34 = arith.constant 0 : index
    %29 = vector.load %arg12[%c0_32, %c0_33, %c0_34] : memref<1x1x32xbf16, #tpu.memory_space<vmem>>, vector<1x1x32xbf16>
    %30 = vector.shape_cast %29 : vector<1x1x32xbf16> to vector<1x32xbf16>
    %31 = arith.extf %30 : vector<1x32xbf16> to vector<1x32xf32>
    %cst = arith.constant dense<0.000000e+00> : vector<16x32xf32>
    %32 = tpu.matmul %3, %13, %cst {dimension_numbers = #tpu.dot_dimension_numbers<[1], [0], [0], [1], [0, 0, 1, 1], [], []>} : vector<16x32xbf16>, vector<32x32xbf16>, vector<16x32xf32> -> vector<16x32xf32>
    %33 = vector.broadcast %22 : vector<1x32xf32> to vector<16x32xf32>
    %34 = arith.addf %32, %33 : vector<16x32xf32>
    %cst_35 = arith.constant 0.353553385 : f32
    %35 = vector.broadcast %cst_35 : f32 to vector<16x32xf32>
    %36 = arith.mulf %34, %35 : vector<16x32xf32>
    %37 = arith.truncf %36 : vector<16x32xf32> to vector<16x32xbf16>
    %38 = vector.shape_cast %37 : vector<16x32xbf16> to vector<2x8x32xbf16>
    %cst_36 = arith.constant dense<0.000000e+00> : vector<16x32xf32>
    %39 = tpu.matmul %7, %15, %cst_36 {dimension_numbers = #tpu.dot_dimension_numbers<[1], [0], [0], [1], [0, 0, 1, 1], [], []>} : vector<16x32xbf16>, vector<32x32xbf16>, vector<16x32xf32> -> vector<16x32xf32>
    %40 = vector.broadcast %25 : vector<1x32xf32> to vector<16x32xf32>
    %41 = arith.addf %39, %40 : vector<16x32xf32>
    %42 = arith.truncf %41 : vector<16x32xf32> to vector<16x32xbf16>
    %43 = vector.shape_cast %42 : vector<16x32xbf16> to vector<2x8x32xbf16>
    %cst_37 = arith.constant dense<0.000000e+00> : vector<16x32xf32>
    %44 = tpu.matmul %11, %17, %cst_37 {dimension_numbers = #tpu.dot_dimension_numbers<[1], [0], [0], [1], [0, 0, 1, 1], [], []>} : vector<16x32xbf16>, vector<32x32xbf16>, vector<16x32xf32> -> vector<16x32xf32>
    %45 = vector.broadcast %28 : vector<1x32xf32> to vector<16x32xf32>
    %46 = arith.addf %44, %45 : vector<16x32xf32>
    %47 = arith.truncf %46 : vector<16x32xf32> to vector<16x32xbf16>
    %48 = vector.shape_cast %47 : vector<16x32xbf16> to vector<2x8x32xbf16>
    %cst_38 = arith.constant 0.000000e+00 : f32
    %49 = vector.broadcast %cst_38 : f32 to vector<2x8x8xf32>
    %50 = vector.extract_strided_slice %38 {offsets = [0, 0, 0], sizes = [2, 8, 8], strides = [1, 1, 1]} : vector<2x8x32xbf16> to vector<2x8x8xbf16>
    %51 = vector.extract_strided_slice %43 {offsets = [0, 0, 0], sizes = [2, 8, 8], strides = [1, 1, 1]} : vector<2x8x32xbf16> to vector<2x8x8xbf16>
    %52 = vector.extract_strided_slice %48 {offsets = [0, 0, 0], sizes = [2, 8, 8], strides = [1, 1, 1]} : vector<2x8x32xbf16> to vector<2x8x8xbf16>
    "tpu.trace_start"() <{level = 10 : i32, message = "nld,nsd->nls"}> : () -> ()
    %cst_39 = arith.constant dense<0.000000e+00> : vector<2x8x8xf32>
    %53 = tpu.matmul %50, %51, %cst_39 {dimension_numbers = #tpu.dot_dimension_numbers<[2], [2], [1], [1], [0, 0, 0, 1, 1, 1], [0], [0]>} : vector<2x8x8xbf16>, vector<2x8x8xbf16>, vector<2x8x8xf32> -> vector<2x8x8xf32>
    "tpu.trace_stop"() : () -> ()
    %cst_40 = arith.constant dense<0xFF800000> : vector<2x8xf32>
    %54 = vector.multi_reduction <maximumf>, %53, %cst_40 [2] : vector<2x8x8xf32> to vector<2x8xf32>
    %55 = vector.shape_cast %54 : vector<2x8xf32> to vector<2x8x1xf32>
    %56 = vector.broadcast %55 : vector<2x8x1xf32> to vector<2x8x8xf32>
    %57 = arith.subf %53, %56 : vector<2x8x8xf32>
    %58 = math.exp %57 : vector<2x8x8xf32>
    %cst_41 = arith.constant dense<0.000000e+00> : vector<2x8xf32>
    %59 = vector.multi_reduction <add>, %58, %cst_41 [2] : vector<2x8x8xf32> to vector<2x8xf32>
    %60 = vector.shape_cast %59 : vector<2x8xf32> to vector<2x8x1xf32>
    %61 = tpu.reciprocal %60 {approx = true} : vector<2x8x1xf32> -> vector<2x8x1xf32>
    %62 = vector.broadcast %61 : vector<2x8x1xf32> to vector<2x8x8xf32>
    %63 = arith.mulf %58, %62 : vector<2x8x8xf32>
    %64 = arith.addf %49, %63 : vector<2x8x8xf32>
    %65 = arith.truncf %63 : vector<2x8x8xf32> to vector<2x8x8xbf16>
    "tpu.trace_start"() <{level = 10 : i32, message = "nls,nsd->nld"}> : () -> ()
    %cst_42 = arith.constant dense<0.000000e+00> : vector<2x8x8xf32>
    %66 = tpu.matmul %65, %52, %cst_42 {dimension_numbers = #tpu.dot_dimension_numbers<[2], [1], [1], [2], [0, 0, 0, 1, 1, 2], [0], [0]>} : vector<2x8x8xbf16>, vector<2x8x8xbf16>, vector<2x8x8xf32> -> vector<2x8x8xf32>
    "tpu.trace_stop"() : () -> ()
    %67 = arith.truncf %66 : vector<2x8x8xf32> to vector<2x8x8xbf16>
    %68 = vector.extract_strided_slice %38 {offsets = [0, 0, 8], sizes = [2, 8, 8], strides = [1, 1, 1]} : vector<2x8x32xbf16> to vector<2x8x8xbf16>
    %69 = vector.extract_strided_slice %43 {offsets = [0, 0, 8], sizes = [2, 8, 8], strides = [1, 1, 1]} : vector<2x8x32xbf16> to vector<2x8x8xbf16>
    %70 = vector.extract_strided_slice %48 {offsets = [0, 0, 8], sizes = [2, 8, 8], strides = [1, 1, 1]} : vector<2x8x32xbf16> to vector<2x8x8xbf16>
    "tpu.trace_start"() <{level = 10 : i32, message = "nld,nsd->nls"}> : () -> ()
    %cst_43 = arith.constant dense<0.000000e+00> : vector<2x8x8xf32>
    %71 = tpu.matmul %68, %69, %cst_43 {dimension_numbers = #tpu.dot_dimension_numbers<[2], [2], [1], [1], [0, 0, 0, 1, 1, 1], [0], [0]>} : vector<2x8x8xbf16>, vector<2x8x8xbf16>, vector<2x8x8xf32> -> vector<2x8x8xf32>
    "tpu.trace_stop"() : () -> ()
    %cst_44 = arith.constant dense<0xFF800000> : vector<2x8xf32>
    %72 = vector.multi_reduction <maximumf>, %71, %cst_44 [2] : vector<2x8x8xf32> to vector<2x8xf32>
    %73 = vector.shape_cast %72 : vector<2x8xf32> to vector<2x8x1xf32>
    %74 = vector.broadcast %73 : vector<2x8x1xf32> to vector<2x8x8xf32>
    %75 = arith.subf %71, %74 : vector<2x8x8xf32>
    %76 = math.exp %75 : vector<2x8x8xf32>
    %cst_45 = arith.constant dense<0.000000e+00> : vector<2x8xf32>
    %77 = vector.multi_reduction <add>, %76, %cst_45 [2] : vector<2x8x8xf32> to vector<2x8xf32>
    %78 = vector.shape_cast %77 : vector<2x8xf32> to vector<2x8x1xf32>
    %79 = tpu.reciprocal %78 {approx = true} : vector<2x8x1xf32> -> vector<2x8x1xf32>
    %80 = vector.broadcast %79 : vector<2x8x1xf32> to vector<2x8x8xf32>
    %81 = arith.mulf %76, %80 : vector<2x8x8xf32>
    %82 = arith.addf %64, %81 : vector<2x8x8xf32>
    %83 = arith.truncf %81 : vector<2x8x8xf32> to vector<2x8x8xbf16>
    "tpu.trace_start"() <{level = 10 : i32, message = "nls,nsd->nld"}> : () -> ()
    %cst_46 = arith.constant dense<0.000000e+00> : vector<2x8x8xf32>
    %84 = tpu.matmul %83, %70, %cst_46 {dimension_numbers = #tpu.dot_dimension_numbers<[2], [1], [1], [2], [0, 0, 0, 1, 1, 2], [0], [0]>} : vector<2x8x8xbf16>, vector<2x8x8xbf16>, vector<2x8x8xf32> -> vector<2x8x8xf32>
    "tpu.trace_stop"() : () -> ()
    %85 = arith.truncf %84 : vector<2x8x8xf32> to vector<2x8x8xbf16>
    %86 = vector.extract_strided_slice %38 {offsets = [0, 0, 16], sizes = [2, 8, 8], strides = [1, 1, 1]} : vector<2x8x32xbf16> to vector<2x8x8xbf16>
    %87 = vector.extract_strided_slice %43 {offsets = [0, 0, 16], sizes = [2, 8, 8], strides = [1, 1, 1]} : vector<2x8x32xbf16> to vector<2x8x8xbf16>
    %88 = vector.extract_strided_slice %48 {offsets = [0, 0, 16], sizes = [2, 8, 8], strides = [1, 1, 1]} : vector<2x8x32xbf16> to vector<2x8x8xbf16>
    "tpu.trace_start"() <{level = 10 : i32, message = "nld,nsd->nls"}> : () -> ()
    %cst_47 = arith.constant dense<0.000000e+00> : vector<2x8x8xf32>
    %89 = tpu.matmul %86, %87, %cst_47 {dimension_numbers = #tpu.dot_dimension_numbers<[2], [2], [1], [1], [0, 0, 0, 1, 1, 1], [0], [0]>} : vector<2x8x8xbf16>, vector<2x8x8xbf16>, vector<2x8x8xf32> -> vector<2x8x8xf32>
    "tpu.trace_stop"() : () -> ()
    %cst_48 = arith.constant dense<0xFF800000> : vector<2x8xf32>
    %90 = vector.multi_reduction <maximumf>, %89, %cst_48 [2] : vector<2x8x8xf32> to vector<2x8xf32>
    %91 = vector.shape_cast %90 : vector<2x8xf32> to vector<2x8x1xf32>
    %92 = vector.broadcast %91 : vector<2x8x1xf32> to vector<2x8x8xf32>
    %93 = arith.subf %89, %92 : vector<2x8x8xf32>
    %94 = math.exp %93 : vector<2x8x8xf32>
    %cst_49 = arith.constant dense<0.000000e+00> : vector<2x8xf32>
    %95 = vector.multi_reduction <add>, %94, %cst_49 [2] : vector<2x8x8xf32> to vector<2x8xf32>
    %96 = vector.shape_cast %95 : vector<2x8xf32> to vector<2x8x1xf32>
    %97 = tpu.reciprocal %96 {approx = true} : vector<2x8x1xf32> -> vector<2x8x1xf32>
    %98 = vector.broadcast %97 : vector<2x8x1xf32> to vector<2x8x8xf32>
    %99 = arith.mulf %94, %98 : vector<2x8x8xf32>
    %100 = arith.addf %82, %99 : vector<2x8x8xf32>
    %101 = arith.truncf %99 : vector<2x8x8xf32> to vector<2x8x8xbf16>
    "tpu.trace_start"() <{level = 10 : i32, message = "nls,nsd->nld"}> : () -> ()
    %cst_50 = arith.constant dense<0.000000e+00> : vector<2x8x8xf32>
    %102 = tpu.matmul %101, %88, %cst_50 {dimension_numbers = #tpu.dot_dimension_numbers<[2], [1], [1], [2], [0, 0, 0, 1, 1, 2], [0], [0]>} : vector<2x8x8xbf16>, vector<2x8x8xbf16>, vector<2x8x8xf32> -> vector<2x8x8xf32>
    "tpu.trace_stop"() : () -> ()
    %103 = arith.truncf %102 : vector<2x8x8xf32> to vector<2x8x8xbf16>
    %104 = vector.extract_strided_slice %38 {offsets = [0, 0, 24], sizes = [2, 8, 8], strides = [1, 1, 1]} : vector<2x8x32xbf16> to vector<2x8x8xbf16>
    %105 = vector.extract_strided_slice %43 {offsets = [0, 0, 24], sizes = [2, 8, 8], strides = [1, 1, 1]} : vector<2x8x32xbf16> to vector<2x8x8xbf16>
    %106 = vector.extract_strided_slice %48 {offsets = [0, 0, 24], sizes = [2, 8, 8], strides = [1, 1, 1]} : vector<2x8x32xbf16> to vector<2x8x8xbf16>
    "tpu.trace_start"() <{level = 10 : i32, message = "nld,nsd->nls"}> : () -> ()
    %cst_51 = arith.constant dense<0.000000e+00> : vector<2x8x8xf32>
    %107 = tpu.matmul %104, %105, %cst_51 {dimension_numbers = #tpu.dot_dimension_numbers<[2], [2], [1], [1], [0, 0, 0, 1, 1, 1], [0], [0]>} : vector<2x8x8xbf16>, vector<2x8x8xbf16>, vector<2x8x8xf32> -> vector<2x8x8xf32>
    "tpu.trace_stop"() : () -> ()
    %cst_52 = arith.constant dense<0xFF800000> : vector<2x8xf32>
    %108 = vector.multi_reduction <maximumf>, %107, %cst_52 [2] : vector<2x8x8xf32> to vector<2x8xf32>
    %109 = vector.shape_cast %108 : vector<2x8xf32> to vector<2x8x1xf32>
    %110 = vector.broadcast %109 : vector<2x8x1xf32> to vector<2x8x8xf32>
    %111 = arith.subf %107, %110 : vector<2x8x8xf32>
    %112 = math.exp %111 : vector<2x8x8xf32>
    %cst_53 = arith.constant dense<0.000000e+00> : vector<2x8xf32>
    %113 = vector.multi_reduction <add>, %112, %cst_53 [2] : vector<2x8x8xf32> to vector<2x8xf32>
    %114 = vector.shape_cast %113 : vector<2x8xf32> to vector<2x8x1xf32>
    %115 = tpu.reciprocal %114 {approx = true} : vector<2x8x1xf32> -> vector<2x8x1xf32>
    %116 = vector.broadcast %115 : vector<2x8x1xf32> to vector<2x8x8xf32>
    %117 = arith.mulf %112, %116 : vector<2x8x8xf32>
    %118 = arith.addf %100, %117 : vector<2x8x8xf32>
    %119 = arith.truncf %117 : vector<2x8x8xf32> to vector<2x8x8xbf16>
    "tpu.trace_start"() <{level = 10 : i32, message = "nls,nsd->nld"}> : () -> ()
    %cst_54 = arith.constant dense<0.000000e+00> : vector<2x8x8xf32>
    %120 = tpu.matmul %119, %106, %cst_54 {dimension_numbers = #tpu.dot_dimension_numbers<[2], [1], [1], [2], [0, 0, 0, 1, 1, 2], [0], [0]>} : vector<2x8x8xbf16>, vector<2x8x8xbf16>, vector<2x8x8xf32> -> vector<2x8x8xf32>
    "tpu.trace_stop"() : () -> ()
    %121 = arith.truncf %120 : vector<2x8x8xf32> to vector<2x8x8xbf16>
    %122 = tpu.concatenate %67, %85, %103, %121 in 2 : vector<2x8x8xbf16>, vector<2x8x8xbf16>, vector<2x8x8xbf16>, vector<2x8x8xbf16> -> vector<2x8x32xbf16>
    %123 = vector.shape_cast %122 : vector<2x8x32xbf16> to vector<16x32xbf16>
    %cst_55 = arith.constant dense<0.000000e+00> : vector<16x32xf32>
    %124 = tpu.matmul %123, %19, %cst_55 {dimension_numbers = #tpu.dot_dimension_numbers<[1], [0], [0], [1], [0, 0, 1, 1], [], []>} : vector<16x32xbf16>, vector<32x32xbf16>, vector<16x32xf32> -> vector<16x32xf32>
    %125 = vector.broadcast %31 : vector<1x32xf32> to vector<16x32xf32>
    %126 = arith.addf %124, %125 : vector<16x32xf32>
    %127 = vector.shape_cast %126 : vector<16x32xf32> to vector<2x8x32xf32>
    %c0_56 = arith.constant 0 : index
    %c0_57 = arith.constant 0 : index
    %c0_58 = arith.constant 0 : index
    %c0_59 = arith.constant 0 : index
    %128 = vector.load %arg13[%c0_56, %c0_57, %c0_58, %c0_59] : memref<1x2x8x32xf32, #tpu.memory_space<vmem>>, vector<1x2x8x32xf32>
    %129 = vector.shape_cast %128 : vector<1x2x8x32xf32> to vector<2x8x32xf32>
    %130 = vector.shape_cast %127 : vector<2x8x32xf32> to vector<1x2x8x32xf32>
    tpu.vector_store %arg13[%c0_56, %c0_57, %c0_58, %c0_59], %130 {strides = array<i32>} : memref<1x2x8x32xf32, #tpu.memory_space<vmem>>, vector<1x2x8x32xf32>,
    %cst_60 = arith.constant 2.500000e-01 : f32
    %131 = vector.broadcast %cst_60 : f32 to vector<2x8x8xf32>
    %132 = arith.mulf %118, %131 : vector<2x8x8xf32>
    %133 = arith.truncf %132 : vector<2x8x8xf32> to vector<2x8x8xbf16>
    %c0_61 = arith.constant 0 : index
    %c0_62 = arith.constant 0 : index
    %c0_63 = arith.constant 0 : index
    %c0_64 = arith.constant 0 : index
    %134 = vector.load %arg14[%c0_61, %c0_62, %c0_63, %c0_64] : memref<1x2x8x8xbf16, #tpu.memory_space<vmem>>, vector<1x2x8x8xbf16>
    %135 = vector.shape_cast %134 : vector<1x2x8x8xbf16> to vector<2x8x8xbf16>
    %136 = vector.shape_cast %133 : vector<2x8x8xbf16> to vector<1x2x8x8xbf16>
    tpu.vector_store %arg14[%c0_61, %c0_62, %c0_63, %c0_64], %136 {strides = array<i32>} : memref<1x2x8x8xbf16, #tpu.memory_space<vmem>>, vector<1x2x8x8xbf16>,
    return
  }
  func.func @transform_0(%arg0: i32, %arg1: i32) -> (i32, i32, i32, i32) {
    %c0_i32 = arith.constant 0 : i32
    %c0_i32_0 = arith.constant 0 : i32
    %c0_i32_1 = arith.constant 0 : i32
    return %arg0, %arg1, %c0_i32, %c0_i32_0 : i32, i32, i32, i32
  }
  func.func @transform_1(%arg0: i32, %arg1: i32) -> (i32, i32, i32, i32) {
    %c0_i32 = arith.constant 0 : i32
    %c0_i32_0 = arith.constant 0 : i32
    %c0_i32_1 = arith.constant 0 : i32
    return %arg0, %arg1, %c0_i32, %c0_i32_0 : i32, i32, i32, i32
  }
  func.func @transform_2(%arg0: i32, %arg1: i32) -> (i32, i32, i32, i32) {
    %c0_i32 = arith.constant 0 : i32
    %c0_i32_0 = arith.constant 0 : i32
    %c0_i32_1 = arith.constant 0 : i32
    return %arg0, %arg1, %c0_i32, %c0_i32_0 : i32, i32, i32, i32
  }
  func.func @transform_3(%arg0: i32, %arg1: i32) -> (i32, i32, i32) {
    %c0_i32 = arith.constant 0 : i32
    %c0_i32_0 = arith.constant 0 : i32
    %c0_i32_1 = arith.constant 0 : i32
    return %arg0, %c0_i32, %c0_i32_0 : i32, i32, i32
  }
  func.func @transform_4(%arg0: i32, %arg1: i32) -> (i32, i32, i32) {
    %c0_i32 = arith.constant 0 : i32
    %c0_i32_0 = arith.constant 0 : i32
    %c0_i32_1 = arith.constant 0 : i32
    return %arg0, %c0_i32, %c0_i32_0 : i32, i32, i32
  }
  func.func @transform_5(%arg0: i32, %arg1: i32) -> (i32, i32, i32) {
    %c0_i32 = arith.constant 0 : i32
    %c0_i32_0 = arith.constant 0 : i32
    %c0_i32_1 = arith.constant 0 : i32
    return %arg0, %c0_i32, %c0_i32_0 : i32, i32, i32
  }
  func.func @transform_6(%arg0: i32, %arg1: i32) -> (i32, i32, i32) {
    %c0_i32 = arith.constant 0 : i32
    %c0_i32_0 = arith.constant 0 : i32
    %c0_i32_1 = arith.constant 0 : i32
    return %arg0, %c0_i32, %c0_i32_0 : i32, i32, i32
  }
  func.func @transform_7(%arg0: i32, %arg1: i32) -> (i32, i32, i32) {
    %c0_i32 = arith.constant 0 : i32
    %c0_i32_0 = arith.constant 0 : i32
    %c0_i32_1 = arith.constant 0 : i32
    return %arg0, %c0_i32, %c0_i32_0 : i32, i32, i32
  }
  func.func @transform_8(%arg0: i32, %arg1: i32) -> (i32, i32, i32) {
    %c0_i32 = arith.constant 0 : i32
    %c0_i32_0 = arith.constant 0 : i32
    %c0_i32_1 = arith.constant 0 : i32
    return %arg0, %c0_i32, %c0_i32_0 : i32, i32, i32
  }
  func.func @transform_9(%arg0: i32, %arg1: i32) -> (i32, i32, i32) {
    %c0_i32 = arith.constant 0 : i32
    %c0_i32_0 = arith.constant 0 : i32
    %c0_i32_1 = arith.constant 0 : i32
    return %arg0, %c0_i32, %c0_i32_0 : i32, i32, i32
  }
  func.func @transform_10(%arg0: i32, %arg1: i32) -> (i32, i32, i32) {
    %c0_i32 = arith.constant 0 : i32
    %c0_i32_0 = arith.constant 0 : i32
    %c0_i32_1 = arith.constant 0 : i32
    return %arg0, %c0_i32, %c0_i32_0 : i32, i32, i32
  }
  func.func @transform_11(%arg0: i32, %arg1: i32) -> (i32, i32, i32, i32) {
    %c0_i32 = arith.constant 0 : i32
    %c0_i32_0 = arith.constant 0 : i32
    %c0_i32_1 = arith.constant 0 : i32
    return %arg0, %arg1, %c0_i32, %c0_i32_0 : i32, i32, i32, i32
  }
  func.func @transform_12(%arg0: i32, %arg1: i32) -> (i32, i32, i32, i32) {
    %c0_i32 = arith.constant 0 : i32
    %c0_i32_0 = arith.constant 0 : i32
    %c0_i32_1 = arith.constant 0 : i32
    return %arg0, %arg1, %c0_i32, %c0_i32_0 : i32, i32, i32, i32
  }
}

</mosaic_0001>

<bundles_post_ra>
// kernel: tpu_custom_call.1
= control target key start
LH: loop header
LB: loop body
LE: loop exit
PB: predicated region body
PF: predicated region fallthrough
CT: control target
= control target key end

     0   :  { %s2891_s0 = inlined_call_operand.hbm [shape: f32[2,2,8,32], index: 0, kind: input, shape index: {}]   ;;  %s2892_s1 = inlined_call_operand.hbm [shape: f32[2,2,8,32], index: 1, kind: input, shape index: {}]   ;;  %s2893_s2 = inlined_call_operand.hbm [shape: f32[2,2,8,32], index: 2, kind: input, shape index: {}]   ;;  %s2894_s3 = inlined_call_operand.hbm [shape: bf16[2,32,32], index: 3, kind: input, shape index: {}]   ;;  %s2895_s4 = inlined_call_operand.vmem [shape: bf16[2,1,32], index: 4, kind: input, shape index: {}]   ;;  %s2896_s5 = inlined_call_operand.hbm [shape: bf16[2,32,32], index: 5, kind: input, shape index: {}]   ;;  %s2897_s6 = inlined_call_operand.vmem [shape: bf16[2,1,32], index: 6, kind: input, shape index: {}]   ;;  %s2898_s7 = inlined_call_operand.hbm [shape: bf16[2,32,32], index: 7, kind: input, shape index: {}]   ;;  %s2899_s8 = inlined_call_operand.vmem [shape: bf16[2,1,32], index: 8, kind: input, shape index: {}]   ;;  %s2900_s9 = inlined_call_operand.hbm [shape: bf16[2,32,32], index: 9, kind: input, shape index: {}]   ;;  %s2901_s10 = inlined_call_operand.vmem [shape: bf16[2,1,32], index: 10, kind: input, shape index: {}]   ;;  %s2902_s11 = inlined_call_operand.hbm [shape: f32[2,2,8,32], index: 11, kind: output, shape index: {0}]   ;;  %s2903_s12 = inlined_call_operand.hbm [shape: bf16[2,2,8,8], index: 12, kind: output, shape index: {1}]  }
   0x1   :  { %2922 = sst [smem:[#allocation30_spill]] %s2891_s0 }
   0x2   :  { %2923 = sst [smem:[#allocation31_spill]] %s2892_s1 }
   0x3   :  { %2924 = sst [smem:[#allocation32_spill]] %s2893_s2 }
   0x4   :  { %2925 = sst [smem:[#allocation33_spill]] %s2894_s3 }
   0x5   :  { %2926 = sst [smem:[#allocation34_spill]] %s2898_s7 }
   0x6   :  { %2927 = sst [smem:[#allocation35_spill]] %s2899_s8 }
   0x7   :  { %2928 = sst [smem:[#allocation36_spill]] %s2901_s10 }
   0x8   :  { %2929 = sst [smem:[#allocation37_spill]] %s2902_s11 }
   0x9   :  { %2930 = sst [smem:[#allocation38_spill]] %s2903_s12 }
   0xa   :  { %18 = vsyncpa [#allocation3], 0 }
   0xb   :  { %20 = vsyncpa [#allocation3 + $0x1], 0 }
   0xc   :  { %21 = vsyncpa [#allocation6], 0 }
   0xd   :  { %23 = vsyncpa [#allocation6 + $0x1], 0 }
   0xe   :  { %24 = vsyncpa [#allocation9], 0 }
   0xf   :  { %26 = vsyncpa [#allocation9 + $0x1], 0 }
  0x10   :  { %27 = vsyncpa [#allocation12], 0 }
  0x11   :  { %29 = vsyncpa [#allocation12 + $0x1], 0 }
  0x12   :  { %30 = vsyncpa [#allocation4], 0 }
  0x13   :  { %32 = vsyncpa [#allocation4 + $0x1], 0 }
  0x14   :  { %33 = vsyncpa [#allocation16], 0 }
  0x15   :  { %35 = vsyncpa [#allocation16 + $0x1], 0  ;;  %s2478_s21 = smov 0   ;;  %s2480_s22 = smov 0  }
  0x16   :  { %s2482_s23 = smov 0   ;;  %s2484_s24 = smov 0  }
  0x17   :  { %s2486_s25 = smov 0   ;;  %s2488_s26 = smov 0  }
  0x18 LB: > { %2931 = sst [smem:[#allocation23_spill]] %s2378_s21  ;;  %s2509_s27 = sadd.s32 4294967295, %s2398_s26   ;;  %s2398_s26 = sphi %s2488_s26, %s41_s26   ;;  %s2394_s25 = sphi %s2486_s25, %s2965_s25   ;;  %s2390_s24 = sphi %s2484_s24, %s2964_s24   ;;  %s2386_s23 = sphi %s2482_s23, %s2968_s23   ;;  %s2382_s22 = sphi %s2480_s22, %s2967_s22   ;;  %s2378_s21 = sphi %s2478_s21, %s2966_s21  }
  0x19   : > { %2932 = sst [smem:[#allocation24_spill]] %s2394_s25  ;;  %s1809_s28 = sadd.s32 4294967294, %s2398_s26  }
  0x1a   : > { %2933 = sst [smem:[#allocation25_spill]] %s2398_s26  ;;  %s53_s29 = sadd.s32 1, %s2394_s25 }
  0x1b   : > { %s62_s30 = sadd.s32 1, %s2386_s23  ;;  %p55_p0 = scmp.ge.s32.totalorder %s53_s29, 2 }
  0x1c   : > { %p69_p1 = scmp.ne.s32.totalorder %s2386_s23, %s2382_s22  ;;  %p70_p2 = scmp.eq.s32.totalorder %s2398_s26, 0 }
  0x1d   : > { %p75_p3 = scmp.ne.s32.totalorder %s2382_s22, %s2378_s21  ;;  %s2970_s29 = smov (%p55_p0, %s53_s29), 0 }
  0x1e   : > { %2934 = sst [smem:[#allocation26_spill]] %s2970_s29  ;;  %p2521_p4 = por %p70_p2, %p69_p1 }
  0x1f   : > { %p76_p5 = scmp.eq.s32.totalorder %s2509_s27, 0  ;;  %s57_s14 = ssub.s32 %s2394_s25, %s2970_s29 }
  0x20   : > { %p365_p6 = scmp.eq.s32.totalorder %s2509_s27, 1  ;;  %p60_p7 = scmp.eq.s32.totalorder %s57_s14, 0 }
  0x21   : > { %p2529_p8 = por %p76_p5, %p75_p3  ;;  %p371_p10 = scmp.eq.s32.totalorder %s1809_s28, 1 }
  0x22   : > { %p2533_p9 = por %p365_p6, %p69_p1  ;;  %p1811_p12 = scmp.ge.s32.totalorder %s2398_s26, 2 }
  0x23   : > { %s2538_s17 = scalar_select %p60_p7, %s2386_s23, %s62_s30  }
  0x24   : > { %s2937_s16 = scalar_select %p2533_p9, 1, 0 }
  0x25   : > { %2939 = sst [smem:[#allocation28_spill]] %s2538_s17  ;;  %p2540_p11 = por %p371_p10, %p75_p3 }
  0x26   : > { %2938 = sst [smem:[#allocation27_spill]] %s2937_s16  ;;  %p1967_p13 = scmp.lt.s32.totalorder %s2398_s26, 2 }
  0x27   : > { %s2940_s18 = scalar_select %p2540_p11, 1, 0 }
  0x28   : > { %s2905_s19 = sand.u32 1, %s2386_s23   ;;  %s2552_s14 = sshll.u32 %s2394_s25, 4 }
  0x29   : > { %2941 = sst [smem:[#allocation29_spill]] %s2940_s18  ;;  %s2549_s20 = sshll.u32 %s2905_s19, 4 }
  0x2a   : > { %p2556_p0 = pnand %p1967_p13, %p2521_p4  ;;  %s2561_s30 = sand.u32 1, %s2398_s26  }
  0x2b   : > { %s2943_s1 = sld [smem:[#allocation31_spill]]  ;;  %s447_s25 = scalar_lea.vmem [#allocation5], %s2549_s20 }
  0x2c   : > { %s457_s21 = sshll.u32 %s447_s25, 4  ;;  %s2913_s13 = scalar_lea.sflag [#allocation6], %s2561_s30  ;;  %s458_s21 = int_to_ptr.vmem [resolvable:$true] %s457_s21 }
  0x2d   : > { %s2914_s11 = smov 128   ;;  %s2916_s10 = smov 8  }
  0x2e   : > { %p1833_p1 = scmp.ge.s32.totalorder %s2398_s26, 1  ;;  %p601_p2 = scmp.lt.s32.totalorder %s2398_s26, 3 }
  0x2f   : > { %s2945_s3 = sld [smem:[#allocation33_spill]]  ;;  %s495_s12 = scalar_lea.vmem [#allocation8], %s2549_s20 }
  0x30   : > { %p2578_p3 = pnand %p1833_p1, %p601_p2  ;;  %s503_s16 = sshll.u32 %s495_s12, 4  ;;  %s504_s16 = int_to_ptr.vmem [resolvable:$true] %s503_s16 }
  0x31   : > { %s454_s19 = scalar_lea.hbm %s2943_s1, %s2552_s14  ;;  %s2946_s7 = sld [smem:[#allocation34_spill]] }
  0x32   : > { %s455_s18 = sshll.u32 %s454_s19, 4  ;;  %s551_s12 = scalar_lea.vmem [#allocation11], %s2549_s20  ;;  %s456_s18 = int_to_ptr.hbm [resolvable:$true] %s455_s18 }
  0x33   : > { %1944 = dma.hbm_to_vmem [thread:$0]  (!%p2556_p0), %s456_s18, 256, %s458_s21, %s2913_s13, %s2914_s11, %s2914_s11, %s2916_s10  }
  0x34   : > { %s2918_s21 = scalar_lea.sflag [#allocation9], %s2561_s30  ;;  %s2402_s18 = smov 64  }
  0x35   : > { %s500_s19 = scalar_lea.hbm %s2945_s3, %s2552_s14  ;;  %s2403_s13 = smov 4  }
  0x36   : > { %s501_s1 = sshll.u32 %s500_s19, 4  ;;  %s559_s11 = sshll.u32 %s551_s12, 4  ;;  %s502_s1 = int_to_ptr.hbm [resolvable:$true] %s501_s1  ;;  %s560_s11 = int_to_ptr.vmem [resolvable:$true] %s559_s11 }
  0x37   : > { %1950 = dma.hbm_to_vmem [thread:$0]  (!%p2556_p0), %s502_s1, 256, %s504_s16, %s2918_s21, %s2402_s18, %s2402_s18, %s2403_s13  }
  0x38   : > { %s556_s19 = scalar_lea.hbm %s2946_s7, %s2552_s14  ;;  %s2921_s3 = scalar_lea.sflag [#allocation12], %s2561_s30 }
  0x39   : > { %s557_s10 = sshll.u32 %s556_s19, 4  ;;  %s2947_s0 = sld [smem:[#allocation30_spill]]  ;;  %s558_s10 = int_to_ptr.hbm [resolvable:$true] %s557_s10 }
  0x3a   : > { %1956 = dma.hbm_to_vmem [thread:$0]  (!%p2556_p0), %s558_s10, 256, %s560_s11, %s2921_s3, %s2402_s18, %s2402_s18, %s2403_s13  }
  0x3b   : > { %s423_s12 = scalar_lea.vmem [#allocation2], %s2549_s20  ;;  %s2948_s21 = sand.u32 1, %s2386_s23  }
  0x3c   : > { %s433_s19 = sshll.u32 %s423_s12, 4  ;;  %s420_s7 = scalar_lea.sflag [#allocation3], %s2948_s21  ;;  %s434_s19 = int_to_ptr.vmem [resolvable:$true] %s433_s19 }
  0x3d   : > { %s2949_s26 = smov 8   ;;  %s2950_s8 = smov 128  }
  0x3e   : > { %s2951_s2 = sld [smem:[#allocation32_spill]]  ;;  %s2952_s21 = scalar_lea.sflag [#allocation6], %s2561_s30 }
  0x3f   : > { %s430_s29 = scalar_lea.hbm %s2947_s0, %s2552_s14  ;;  %s523_s10 = scalar_lea.vmem [#allocation10], %s2549_s20 }
  0x40   : > { %s431_s17 = sshll.u32 %s430_s29, 4  ;;  %s471_s29 = scalar_lea.vmem [#allocation7], %s2549_s20  ;;  %s432_s17 = int_to_ptr.hbm [resolvable:$true] %s431_s17 }
  0x41   : > { %1941 = dma.hbm_to_vmem [thread:$0]  (!%p2556_p0), %s432_s17, 256, %s434_s19, %s420_s7, %s2950_s8, %s2950_s8, %s2949_s26  }
  0x42   : > { %s481_s12 = sshll.u32 %s471_s29, 4  ;;  %s528_s17 = scalar_lea.hbm %s2896_s5, %s2552_s14  ;;  %s482_s12 = int_to_ptr.vmem [resolvable:$true] %s481_s12 }
  0x43   : > { %s529_s19 = sshll.u32 %s528_s17, 4  ;;  %s531_s11 = sshll.u32 %s523_s10, 4  ;;  %s530_s19 = int_to_ptr.hbm [resolvable:$true] %s529_s19  ;;  %s532_s11 = int_to_ptr.vmem [resolvable:$true] %s531_s11 }
  0x44   : > { %s478_s1 = scalar_lea.hbm %s2951_s2, %s2552_s14  ;;  %s584_s2 = scalar_lea.hbm %s2900_s9, %s2552_s14 }
  0x45   : > { %s479_s16 = sshll.u32 %s478_s1, 4  ;;  %s2953_s1 = scalar_lea.sflag [#allocation9], %s2561_s30  ;;  %s480_s16 = int_to_ptr.hbm [resolvable:$true] %s479_s16 }
  0x46   : > { %1947 = dma.hbm_to_vmem [thread:$0]  (!%p2556_p0), %s480_s16, 256, %s482_s12, %s2952_s21, %s2950_s8, %s2950_s8, %s2949_s26  }
  0x47   : > { %1953 = dma.hbm_to_vmem [thread:$0]  (!%p2556_p0), %s530_s19, 256, %s532_s11, %s2953_s1, %s2402_s18, %s2402_s18, %s2403_s13  }
  0x48   : > { %s585_s8 = sshll.u32 %s584_s2, 4  ;;  %s579_s26 = scalar_lea.vmem [#allocation13], %s2549_s20  ;;  %s586_s8 = int_to_ptr.hbm [resolvable:$true] %s585_s8 }
  0x49   : > { %s587_s16 = sshll.u32 %s579_s26, 4  ;;  %s2954_s3 = scalar_lea.sflag [#allocation12], %s2561_s30  ;;  %s588_s16 = int_to_ptr.vmem [resolvable:$true] %s587_s16 }
  0x4a   : > { %1959 = dma.hbm_to_vmem [thread:$0]  (!%p2556_p0), %s586_s8, 256, %s588_s16, %s2954_s3, %s2402_s18, %s2402_s18, %s2403_s13  }
  0x4b   : > { %605 = sbr.rel (%p2578_p3) target bundleno = 1214 (0x4be), region = 64  ;;  %s2659_s12 = sand.u32 (!%p2578_p3), 1, %s2382_s22  }
  0x4c   : > { %s2662_s0 = sshll.u32 (!%p2578_p3), %s2659_s12, 4  ;;  %s608_s2 = scalar_lea.sflag (!%p2578_p3), [#allocation3], %s2659_s12 }
  0x4d   : > { %s611_s20 = scalar_lea.vmem (!%p2578_p3), [#allocation2], %s2662_s0 }
  0x50   : > { %2353 = dma.done.wait (%p2529_p8), %s608_s2, 256  }
  0x51   : > { %2355 = vsyncadd (%p2529_p8), %s608_s2, 4294967040  ;;  %s617_s14 = sand.u32 1, %s2509_s27   ;;  %s621_s30 = scalar_lea.vmem [#allocation5], %s2662_s0 }
  0x52   : > { %s618_s28 = scalar_lea.sflag [#allocation6], %s617_s14 }
  0x53   : > { %2357 = dma.done.wait (%p2529_p8), %s618_s28, 512  }
  0x54   : > { %2359 = vsyncadd (%p2529_p8), %s618_s28, 4294966784  ;;  %s631_s13 = scalar_lea.vmem [#allocation7], %s2662_s0  ;;  %s638_s25 = scalar_lea.sflag [#allocation9], %s617_s14 }
  0x55   : > { %s641_s18 = scalar_lea.vmem [#allocation8], %s2662_s0 }
  0x56   : > { %2361 = dma.done.wait (%p2529_p8), %s638_s25, 512  }
  0x57   : > { %2363 = vsyncadd (%p2529_p8), %s638_s25, 4294966784  ;;  %s651_s27 = scalar_lea.vmem [#allocation10], %s2662_s0  ;;  %s658_s21 = scalar_lea.sflag [#allocation12], %s617_s14 }
  0x58   : > { %s661_s7 = scalar_lea.vmem [#allocation11], %s2662_s0 }
  0x59   : > { %2365 = dma.done.wait (%p2529_p8), %s658_s21, 512  }
  0x5a   : > { %2367 = vsyncadd (%p2529_p8), %s658_s21, 4294966784  ;;  %v1911_v0 = vld [vmem:[%s641_s18 + $0x8] sm:$0xff]  ;;  %v1910_v2 = vld [vmem:[%s641_s18] sm:$0xff]  ;;  %vm824_vm0 = vcmask 261120   ;;  %p763_p4 = scmp.lt.s32.totalorder %s2390_s24, 1  ;;  %vm910_vm1 = vcmask 64512  }
  0x5b   : > { %v1913_v1 = vld [vmem:[%s651_s27 + $0x8] sm:$0xff]  ;;  %v1912_v3 = vld [vmem:[%s651_s27] sm:$0xff]  ;;  %834 = vmatpush.bf16.msra.mxu0 %v1911_v0  ;;  %s2404_s8 = smov 112   ;;  %s2405_s26 = smov 120   ;;  %vm978_vm2 = vcmask 1043456   ;;  %vm1469_vm3 = vcmask 60416  }
  0x5c   : > { %v778_v4 = vld [vmem:[%s611_s20] sm:$0xff]  ;;  %868 = vmatpush.bf16.msra.mxu1 %v1913_v1  ;;  %v779_v5 = vld [vmem:[%s611_s20 + $0x8] sm:$0xff]  ;;  %s2692_s15 = scalar_select %p763_p4, %s2390_s24, 1  ;;  %vm1418_vm4 = vcmask 130048   ;;  %vm1423_vm5 = vcmask 195584  }
  0x5d   : > { %v781_v6 = vld [vmem:[%s621_s30] sm:$0xff]  ;;  %v782_v7 = vld [vmem:[%s621_s30 + $0x8] sm:$0xff]  ;;  %v780_v8 = vpack.c.bf16 %v779_v5, %v778_v4  ;;  %s2406_s16 = smov 104   ;;  %s2955_s20 = sld [smem:[#allocation35_spill]] }
  0x5e   : > { %v783_v9 = vpack.c.bf16 %v782_v7, %v781_v6  ;;  %s765_s10 = scalar_lea.vmem %s2895_s4, %s2692_s15  ;;  %s768_s29 = scalar_lea.vmem %s2897_s6, %s2692_s15  ;;  %v1915_v53 = vld [vmem:[%s661_s7 + $0x8] sm:$0xff]  ;;  %v1914_v54 = vld [vmem:[%s661_s7] sm:$0xff] }
  0x5f   : > { %835 = vmatpush.bf16.msra.mxu0 %v1910_v2  ;;  %v803_v10 = vld [vmem:[%s765_s10] sm:$0x1]  ;;  %900 = vmatpush.bf16.msra.mxu2 %v1915_v53  ;;  %v785_v56 = vld [vmem:[%s631_s13 + $0x8] sm:$0xff]  ;;  %s1842_s28 = sshll.u32 %s2659_s12, 3  ;;  %s2408_s25 = smov 16  }
  0x60   : > { %869 = vmatpush.bf16.msra.mxu1 %v1912_v3  ;;  %v805_v11 = vld [vmem:[%s768_s29] sm:$0x1]  ;;  %v804_v12 = vunpack.c.l.bf16 %v803_v10  ;;  %s2808_s30 = scalar_lea.vmem [#allocation15], %s1842_s28  ;;  %s2409_s18 = smov 24  }
  0x61   : > { %v806_v13 = vunpack.c.l.bf16 %v805_v11  ;;  %v784_v55 = vld [vmem:[%s631_s13] sm:$0xff]  ;;  %s2407_s13 = smov 8   ;;  %s671_s27 = scalar_lea.vmem [#allocation13], %s2662_s0 }
  0x62   : > { %1851 = vmatmul.msk.bf16.vlgmr.msra.gmra.mxu0 %vm824_vm0, %v780_v8  ;;  %v811_v14 = vperm.slane %v804_v12, 0  ;;  %v786_v59 = vpack.c.bf16 %v785_v56, %v784_v55  ;;  %s1919_s7 = sshll.u32 %s2390_s24, 3  ;;  %s2957_s10 = sld [smem:[#allocation38_spill]] }
  0x63   : > { %1860 = vmatmul.msk.bf16.vlgmr.msra.gmra.mxu1 %vm824_vm0, %v783_v9  ;;  %v846_v15 = vperm.slane %v806_v13, 0  ;;  %901 = vmatpush.bf16.msra.mxu2 %v1914_v54  ;;  %s771_s14 = scalar_lea.vmem %s2955_s20, %s2692_s15  ;;  %s1511_s1 = sshll.u32 %s2808_s30, 4  ;;  %s1512_s1 = int_to_ptr.vmem [resolvable:$true] %s1511_s1 }
  0x66   : > { %1869 = vmatmul.msk.bf16.vlgmr.msra.gmra.mxu2 %vm824_vm0, %v786_v59 }
  0x68   : > { %s1510_s11 = scalar_lea.hbm %s2957_s10, %s1919_s7  ;;  %s2292_s20 = scalar_lea.hbm %s2957_s10, 16 }
  0x69   : > { %s1513_s29 = sshll.u32 %s1510_s11, 4  ;;  %s1514_s29 = int_to_ptr.hbm [resolvable:$true] %s1513_s29 }
  0xdf   : > { %v837_v16 = vpop.f32.mrf.mxu0 }
  0xe0   : > { %v871_v17 = vpop.f32.mrf.mxu1  ;;  %v838_v18 = vadd.f32 %v837_v16, %v811_v14  ;;  %v807_v16 = vld [vmem:[%s771_s14] sm:$0x1] }
  0xe1   : > { %v872_v19 = vadd.f32 %v871_v17, %v846_v15 }
  0xe2   : > { %v842_v20 = vmul.f32 0.35355338, %v838_v18 }
  0xe3   : > { %v876_v21 = vpack.c.bf16 %v872_v19, %v872_v19  ;;  %v808_v19 = vunpack.c.l.bf16 %v807_v16 }
  0xe4   : > { %v844_v22 = vpack.c.bf16 %v842_v20, %v842_v20 }
  0xe5   : > { %v1022_v23 = vunpack.c.l.b16 %v876_v21  ;;  %v915_v24 = vsel %vm910_vm1, %v876_v21, 0  ;;  %v878_v21 = vperm.slane %v808_v19, 0 }
  0xe6   : > { %924 = vmatpush.bf16.xpose.msra.mxu3 %v915_v24  ;;  %v1017_v25 = vunpack.c.l.b16 %v844_v22 }
  0xe7   : > { %v1023_v26 = vpack.c.b16 %v1022_v23, %v1022_v23  ;;  %v839_v27 = vpop.f32.mrf.mxu0 }
  0xe8   : > { %v873_v28 = vpop.f32.mrf.mxu1  ;;  %v840_v29 = vadd.f32 %v839_v27, %v811_v14  ;;  %v1018_v31 = vpack.c.b16 %v1017_v25, %v1017_v25 }
  0xe9   : > { %v874_v30 = vadd.f32 %v873_v28, %v846_v15  ;;  %1152 = vrot.lane.b32.xlu2 %v1023_v26, %s2404_s8  ;;  %1024 = vrot.lane.b32.xlu0 %v1023_v26, %s2405_s26  ;;  %v903_v25 = vpop.f32.mrf.mxu2 }
  0xea   : > { %v843_v32 = vmul.f32 0.35355338, %v840_v29  ;;  %1019 = vrot.lane.b32.xlu1 %v1018_v31, %s2405_s26  ;;  %v904_v27 = vadd.f32 %v903_v25, %v878_v21 }
  0xeb   : > { %v877_v33 = vpack.c.bf16 %v874_v30, %v874_v30 }
  0xec   : > { %v845_v34 = vpack.c.bf16 %v843_v32, %v843_v32  ;;  %v908_v30 = vpack.c.bf16 %v904_v27, %v904_v27 }
  0xed   : > { %v1051_v35 = vunpack.c.l.b16 %v877_v33  ;;  %1870 = vmatmul.msk.bf16.vlgmr.msra.gmra.mxu3 %vm910_vm1, %v844_v22  ;;  %v934_v36 = vsel %vm910_vm1, %v877_v33, 0 }
  0xee   : > { %943 = vmatpush.bf16.xpose.msrb.mxu0 %v934_v36  ;;  %v1046_v37 = vunpack.c.l.b16 %v845_v34 }
  0xef   : > { %v1052_v38 = vpack.c.b16 %v1051_v35, %v1051_v35 }
  0xf0   : > { %v1047_v39 = vpack.c.b16 %v1046_v37, %v1046_v37 }
  0xf1   : > { %1175 = vrot.lane.b32.xlu2 %v1052_v38, %s2404_s8  ;;  %1053 = vrot.lane.b32.xlu0 %v1052_v38, %s2405_s26  ;;  %v905_v33 = vpop.f32.mrf.mxu2 }
  0xf2   : > { %1048 = vrot.lane.b32.xlu1 %v1047_v39, %s2405_s26  ;;  %v906_v35 = vadd.f32 %v905_v33, %v878_v21 }
  0xf4   : > { %v909_v36 = vpack.c.bf16 %v906_v35, %v906_v35 }
  0xf5   : > { %1871 = vmatmul.msk.bf16.vlgmr.msrb.gmra.mxu0 %vm910_vm1, %v845_v34 }
  0xf6   : > { %v999_v37 = vsel %vm978_vm2, %v909_v36, 0 }
  0xf7   : > { %1008 = vmatpush.bf16.msrb.mxu2 %v999_v37 }
  0xf9   : > { %1268 = vrot.lane.b32.xlu2 %v1023_v26, %s2406_s16  ;;  %1150 = vrot.lane.b32.xlu0 %v1018_v31, %s2404_s8 }
  0xfa   : > { %1173 = vrot.lane.b32.xlu1 %v1047_v39, %s2404_s8 }
 0x101   : > { %1289 = vrot.lane.b32.xlu2 %v1047_v39, %s2406_s16  ;;  %1291 = vrot.lane.b32.xlu0 %v1052_v38, %s2406_s16 }
 0x102   : > { %1266 = vrot.lane.b32.xlu1 %v1018_v31, %s2406_s16  ;;  %v980_v31 = vsel %vm978_vm2, %v908_v30, 0 }
 0x103   : > { %989 = vmatpush.bf16.msrb.mxu1 %v980_v31 }
 0x143   : > { %v1153_v40 = vpop.permute.xlu2 %1152 }
 0x144   : > { %v1158_v44 = vsel %vm910_vm1, %v1153_v40, 0  ;;  %v1101_v40 = vunpack.c.l.b16 %v908_v30 }
 0x14b   : > { %v1176_v41 = vpop.permute.xlu2 %1175 }
 0x14c   : > { %v1181_v50 = vsel %vm910_vm1, %v1176_v41, 0 }
 0x153   : > { %v1269_v45 = vpop.permute.xlu2 %1268 }
 0x154   : > { %v1274_v48 = vsel %vm910_vm1, %v1269_v45, 0 }
 0x15b   : > { %v1025_v42 = vpop.permute.xlu0 %1024  ;;  %v1290_v4 = vpop.permute.xlu2 %1289 }
 0x15c   : > { %v1030_v43 = vsel %vm910_vm1, %v1025_v42, 0  ;;  %v1020_v46 = vpop.permute.xlu1 %1019 }
 0x15d   : > { %1039 = vmatpush.bf16.xpose.msrb.mxu3 %v1030_v43  ;;  %v2764_v43 = vpack.c.b16 %v1101_v40, %v1101_v40 }
 0x163   : > { %v1054_v47 = vpop.permute.xlu0 %1053 }
 0x164   : > { %v1059_v49 = vsel %vm910_vm1, %v1054_v47, 0  ;;  %1874 = vmatmul.msk.bf16.vlgmr.msrb.gmra.mxu3 %vm910_vm1, %v1020_v46  ;;  %v1049_v51 = vpop.permute.xlu1 %1048  ;;  %v1125_v46 = vunpack.c.l.b16 %v909_v36 }
 0x165   : > { %1167 = vmatpush.bf16.xpose.msra.mxu3 %v1158_v44  ;;  %1068 = vmatpush.bf16.xpose.msra.mxu0 %v1059_v49 }
 0x166   : > { %v1126_v47 = vpack.c.b16 %v1125_v46, %v1125_v46 }
 0x16b   : > { %v1151_v52 = vpop.permute.xlu0 %1150 }
 0x16c   : > { %1875 = vmatmul.msk.bf16.vlgmr.msra.gmra.mxu0 %vm910_vm1, %v1049_v51  ;;  %v1174_v1 = vpop.permute.xlu1 %1173 }
 0x16d   : > { %1283 = vmatpush.bf16.xpose.msrb.mxu3 %v1274_v48  ;;  %1190 = vmatpush.bf16.xpose.msrb.mxu0 %v1181_v50 }
 0x170   : > { %v926_v57 = vpop.f32.mrf.mxu3 }
 0x171   : > { %v949_v58 = vsel %vm910_vm1, %v926_v57, -inf }
 0x172   : > { %v945_v60 = vpop.f32.mrf.mxu0  ;;  %950 = vmax.xlane.f32.xlu1 %v949_v58 }
 0x173   : > { %v1292_v61 = vpop.permute.xlu0 %1291  ;;  %v952_v62 = vsel %vm910_vm1, %v945_v60, -inf }
 0x174   : > { %v1297_v63 = vsel %vm910_vm1, %v1292_v61, 0  ;;  %953 = vmax.xlane.f32.xlu0 %v952_v62  ;;  %1878 = vmatmul.msk.bf16.vlgmr.msra.gmra.mxu3 %vm910_vm1, %v1151_v52  ;;  %v1267_v3 = vpop.permute.xlu1 %1266 }
 0x175   : > { %1306 = vmatpush.bf16.xpose.msra.mxu0 %v1297_v63 }
 0x178   : > { %v928_v0 = vpop.f32.mrf.mxu3 }
 0x17a   : > { %v947_v2 = vpop.f32.mrf.mxu0 }
 0x17c   : > { %1879 = vmatmul.msk.bf16.vlgmr.msrb.gmra.mxu0 %vm910_vm1, %v1174_v1 }
 0x184   : > { %1882 = vmatmul.msk.bf16.vlgmr.msrb.gmra.mxu3 %vm910_vm1, %v1267_v3 }
 0x18c   : > { %1883 = vmatmul.msk.bf16.vlgmr.msra.gmra.mxu0 %vm910_vm1, %v1290_v4 }
 0x1e5   : > { %v951_v5 = vpop.xlane.xlu1 %950 }
 0x1e6   : > { %v955_v9 = vsub.f32 %v926_v57, %v951_v5 }
 0x1e7   : > { %v954_v6 = vpop.xlane.xlu0 %953  ;;  %v2741_v7 = vpop.f32.mrf.mxu3 }
 0x1e8   : > { %v956_v8 = vsub.f32 %v945_v60, %v954_v6  ;;  %v957_v13 = vmul.f32 1.442695, %v955_v9  ;;  %v1074_v18 = vsel %vm910_vm1, %v2741_v7, -inf }
 0x1e9   : > { %v1070_v10 = vpop.f32.mrf.mxu0 }
 0x1ea   : > { %v959_v11 = vmul.f32 1.442695, %v956_v8  ;;  %v1077_v12 = vsel %vm910_vm1, %v1070_v10, -inf }
 0x1eb   : > { %1078 = vmax.xlane.f32.xlu2 %v1077_v12 }
 0x1ec   : > { %2030 = vpow2.f32 %v959_v11 }
 0x1ed   : > { %2032 = vpow2.f32 %v957_v13 }
 0x1ef   : > { %v1043_v14 = vpop.f32.mrf.mxu3 }
 0x1f1   : > { %v1072_v15 = vpop.f32.mrf.mxu0 }
 0x1f2   : > { %v2031_v17 = vpop.eup %2030 }
 0x1f3   : > { %1075 = vmax.xlane.f32.xlu2 %v1074_v18  ;;  %v964_v20 = vsel %vm910_vm1, %v2031_v17, 0.0  ;;  %v2751_v22 = vpop.eup %2032 }
 0x1f4   : > { %965 = vadd.xlane.f32.xlu0 %v964_v20  ;;  %v961_v28 = vsel %vm910_vm1, %v2751_v22, 0.0 }
 0x1f7   : > { %v1169_v23 = vpop.f32.mrf.mxu3 }
 0x1f8   : > { %v1196_v24 = vsel %vm910_vm1, %v1169_v23, -inf }
 0x1f9   : > { %v1192_v26 = vpop.f32.mrf.mxu0  ;;  %1197 = vmax.xlane.f32.xlu1 %v1196_v24 }
 0x1fa   : > { %v1199_v29 = vsel %vm910_vm1, %v1192_v26, -inf }
 0x1fb   : > { %962 = vadd.xlane.f32.xlu2 %v961_v28 }
 0x1fc   : > { %1200 = vmax.xlane.f32.xlu0 %v1199_v29 }
 0x1ff   : > { %v1171_v32 = vpop.f32.mrf.mxu3 }
 0x201   : > { %v1194_v34 = vpop.f32.mrf.mxu0 }
 0x207   : > { %v2759_v38 = vpop.f32.mrf.mxu3 }
 0x208   : > { %v1312_v39 = vsel %vm910_vm1, %v2759_v38, -inf }
 0x209   : > { %v1308_v41 = vpop.f32.mrf.mxu0  ;;  %1313 = vmax.xlane.f32.xlu1 %v1312_v39 }
 0x20a   : > { %v1315_v42 = vsel %vm910_vm1, %v1308_v41, -inf }
 0x20b   : > { %1316 = vmax.xlane.f32.xlu2 %v1315_v42 }
 0x20f   : > { %v1287_v44 = vpop.f32.mrf.mxu3 }
 0x210   : > { %1103 = vrot.lane.b32.xlu0 %v2764_v43, %s2405_s26 }
 0x211   : > { %v1310_v45 = vpop.f32.mrf.mxu0 }
 0x222   : > { %1243 = vrot.lane.b32.xlu1 %v1126_v47, %s2404_s8 }
 0x223   : > { %1127 = vrot.lane.b32.xlu2 %v1126_v47, %s2405_s26  ;;  %s2286_s26 = sshra.s32 %s1514_s29, 4  ;;  %s2287_s26 = int_to_ptr.hbm [resolvable:$true] %s2286_s26 }
 0x224   : > { %p2293_p8 = scmp.lt.s32.totalorder %s2287_s26, %s2957_s10 }
 0x25e   : > { %v1079_v48 = vpop.xlane.xlu2 %1078 }
 0x25f   : > { %v1081_v49 = vsub.f32 %v1070_v10, %v1079_v48 }
 0x261   : > { %v1084_v50 = vmul.f32 1.442695, %v1081_v49 }
 0x263   : > { %2034 = vpow2.f32 %v1084_v50 }
 0x266   : > { %v1076_v51 = vpop.xlane.xlu2 %1075 }
 0x267   : > { %v1080_v52 = vsub.f32 %v2741_v7, %v1076_v51  ;;  %v966_v53 = vpop.xlane.xlu0 %965 }
 0x268   : > { %2036 = vrcp.f32 %v966_v53 }
 0x269   : > { %v2035_v54 = vpop.eup %2034  ;;  %v1082_v55 = vmul.f32 1.442695, %v1080_v52 }
 0x26a   : > { %v1089_v56 = vsel %vm910_vm1, %v2035_v54, 0.0 }
 0x26b   : > { %2038 = vpow2.f32 %v1082_v55  ;;  %1090 = vadd.xlane.f32.xlu0 %v1089_v56 }
 0x26c   : > { %v1198_v57 = vpop.xlane.xlu1 %1197 }
 0x26d   : > { %v1202_v58 = vsub.f32 %v1169_v23, %v1198_v57 }
 0x26e   : > { %v2037_v59 = vpop.eup %2036  ;;  %v963_v60 = vpop.xlane.xlu2 %962 }
 0x26f   : > { %v2772_v61 = vmul.f32 %v2037_v59, %v2031_v17  ;;  %v1204_v62 = vmul.f32 1.442695, %v1202_v58  ;;  %2040 = vrcp.f32 %v963_v60  ;;  %v1201_v63 = vpop.xlane.xlu0 %1200 }
 0x270   : > { %v1203_v1 = vsub.f32 %v1192_v26, %v1201_v63 }
 0x271   : > { %v2039_v0 = vpop.eup %2038  ;;  %2042 = vpow2.f32 %v1204_v62  ;;  %v974_v2 = vpack.c.bf16 %v2772_v61, %v2772_v61 }
 0x272   : > { %v1086_v3 = vsel %vm910_vm1, %v2039_v0, 0.0  ;;  %v1206_v5 = vmul.f32 1.442695, %v1203_v1 }
 0x273   : > { %1873 = vmatmul.msk.bf16.vlgmr.msrb.gmra.mxu2 %vm910_vm1, %v974_v2  ;;  %1087 = vadd.xlane.f32.xlu1 %v1086_v3 }
 0x274   : > { %2044 = vpow2.f32 %v1206_v5 }
 0x275   : > { %v2041_v4 = vpop.eup %2040 }
 0x276   : > { %v2779_v6 = vmul.f32 %v2041_v4, %v2751_v22 }
 0x277   : > { %v2043_v7 = vpop.eup %2042 }
 0x278   : > { %v973_v8 = vpack.c.bf16 %v2779_v6, %v2779_v6  ;;  %v1208_v9 = vsel %vm910_vm1, %v2043_v7, 0.0 }
 0x27a   : > { %1872 = vmatmul.msk.bf16.vlgmr.msrb.gmra.mxu1 %vm910_vm1, %v973_v8  ;;  %v2045_v11 = vpop.eup %2044 }
 0x27b   : > { %1209 = vadd.xlane.f32.xlu1 %v1208_v9  ;;  %v1211_v14 = vsel %vm910_vm1, %v2045_v11, 0.0 }
 0x27c   : > { %v1314_v21 = vpop.xlane.xlu1 %1313 }
 0x27d   : > { %v1318_v24 = vsub.f32 %v2759_v38, %v1314_v21 }
 0x27e   : > { %v1317_v10 = vpop.xlane.xlu2 %1316 }
 0x27f   : > { %v1319_v12 = vsub.f32 %v1308_v41, %v1317_v10  ;;  %1222 = vrot.lane.b32.xlu0 %v2764_v43, %s2404_s8  ;;  %v1320_v25 = vmul.f32 1.442695, %v1318_v24  ;;  %s1478_s8 = scalar_lea.sflag [#allocation16], %s2659_s12 }
 0x281   : > { %v1322_v13 = vmul.f32 1.442695, %v1319_v12 }
 0x282   : > { %v1104_v18 = vpop.permute.xlu0 %1103 }
 0x283   : > { %2046 = vpow2.f32 %v1322_v13  ;;  %1212 = vadd.xlane.f32.xlu1 %v1211_v14  ;;  %v1109_v20 = vsel %vm978_vm2, %v1104_v18, 0 }
 0x284   : > { %1118 = vmatpush.bf16.msra.mxu1 %v1109_v20  ;;  %2048 = vpow2.f32 %v1320_v25 }
 0x286   : > { %v1128_v15 = vpop.permute.xlu2 %1127 }
 0x287   : > { %v1133_v16 = vsel %vm978_vm2, %v1128_v15, 0 }
 0x288   : > { %1142 = vmatpush.bf16.msra.mxu2 %v1133_v16 }
 0x289   : > { %v2047_v17 = vpop.eup %2046 }
 0x28a   : > { %v1327_v19 = vsel %vm910_vm1, %v2047_v17, 0.0  ;;  %v2049_v26 = vpop.eup %2048 }
 0x28b   : > { %1328 = vadd.xlane.f32.xlu2 %v1327_v19  ;;  %v1324_v27 = vsel %vm910_vm1, %v2049_v26, 0.0 }
 0x294   : > { %v1244_v22 = vpop.permute.xlu1 %1243 }
 0x295   : > { %v1249_v23 = vsel %vm978_vm2, %v1244_v22, 0 }
 0x296   : > { %1258 = vmatpush.bf16.msrb.mxu2 %v1249_v23 }
 0x29c   : > { %1359 = vrot.lane.b32.xlu1 %v1126_v47, %s2406_s16 }
 0x2a4   : > { %1338 = vrot.lane.b32.xlu1 %v2764_v43, %s2406_s16  ;;  %s2288_s16 = scalar_lea.hbm %s2287_s26, 8 }
 0x2a5   : > { %p2289_p5 = scmp.ne.s32.totalorder %s2287_s26, %s2288_s16  ;;  %p2294_p10 = scmp.lt.s32.totalorder %s2292_s20, %s2288_s16 }
 0x2a7   : > { %p2290_p6 = pnand %p2289_p5, %p2533_p9  ;;  %p2295_p13 = por %p2294_p10, %p2293_p8 }
 0x2a9   : > { %1325 = vadd.xlane.f32.xlu0 %v1324_v27  ;;  %p2291_p7 = pneg %p2290_p6 }
 0x2ab   : > { %p2296_p0 = pnand %p2295_p13, %p2291_p7 }
 0x2de   : > { %v1091_v28 = vpop.xlane.xlu0 %1090 }
 0x2df   : > { %2050 = vrcp.f32 %v1091_v28 }
 0x2e5   : > { %v2051_v29 = vpop.eup %2050 }
 0x2e6   : > { %v1095_v30 = vmul.f32 %v2051_v29, %v2035_v54  ;;  %v1088_v31 = vpop.xlane.xlu1 %1087 }
 0x2e7   : > { %2052 = vrcp.f32 %v1088_v31 }
 0x2e8   : > { %v1099_v32 = vpack.c.bf16 %v1095_v30, %v1095_v30  ;;  %v1097_v51 = vadd.f32 %v1095_v30, %v2772_v61 }
 0x2ea   : > { %1877 = vmatmul.msk.bf16.vlgmr.msra.gmra.mxu2 %vm910_vm1, %v1099_v32 }
 0x2ed   : > { %v2053_v33 = vpop.eup %2052 }
 0x2ee   : > { %v1094_v34 = vmul.f32 %v2053_v33, %v2039_v0  ;;  %v1210_v35 = vpop.xlane.xlu1 %1209 }
 0x2ef   : > { %2054 = vrcp.f32 %v1210_v35 }
 0x2f0   : > { %v1098_v36 = vpack.c.bf16 %v1094_v34, %v1094_v34  ;;  %v1096_v0 = vadd.f32 %v1094_v34, %v2779_v6 }
 0x2f1   : > { %v1223_v37 = vpop.permute.xlu0 %1222 }
 0x2f2   : > { %v1228_v38 = vsel %vm978_vm2, %v1223_v37, 0  ;;  %1876 = vmatmul.msk.bf16.vlgmr.msra.gmra.mxu1 %vm910_vm1, %v1098_v36 }
 0x2f3   : > { %1237 = vmatpush.bf16.msrb.mxu1 %v1228_v38  ;;  %v1917_v38 = vld [vmem:[%s671_s27 + $0x8] sm:$0xff] }
 0x2f4   : > { %1455 = vmatpush.bf16.msra.mxu3 %v1917_v38 }
 0x2f5   : > { %v2055_v42 = vpop.eup %2054 }
 0x2f6   : > { %v2800_v39 = vpop.f32.mrf.mxu2  ;;  %v1213_v40 = vpop.xlane.xlu1 %1212  ;;  %v1216_v43 = vmul.f32 %v2055_v42, %v2043_v7 }
 0x2f7   : > { %2056 = vrcp.f32 %v1213_v40  ;;  %v2802_v41 = vpop.f32.mrf.mxu1  ;;  %v1916_v40 = vld [vmem:[%s671_s27] sm:$0xff] }
 0x2f8   : > { %v1220_v49 = vpack.c.bf16 %v1216_v43, %v1216_v43  ;;  %v1218_v2 = vadd.f32 %v1216_v43, %v1096_v0  ;;  %1456 = vmatpush.bf16.msra.mxu3 %v1916_v40 }
 0x2fd   : > { %v2057_v44 = vpop.eup %2056 }
 0x2fe   : > { %v1217_v45 = vmul.f32 %v2057_v44, %v2045_v11  ;;  %v1012_v46 = vpop.f32.mrf.mxu2  ;;  %v1329_v47 = vpop.xlane.xlu2 %1328 }
 0x2ff   : > { %2058 = vrcp.f32 %v1329_v47  ;;  %v993_v48 = vpop.f32.mrf.mxu1  ;;  %v1015_v47 = vpack.c.bf16 %v2800_v39, %v2800_v39 }
 0x300   : > { %v1221_v50 = vpack.c.bf16 %v1217_v45, %v1217_v45  ;;  %v1219_v53 = vadd.f32 %v1217_v45, %v1097_v51  ;;  %v1014_v45 = vpack.c.bf16 %v2802_v41, %v2802_v41 }
 0x302   : > { %1880 = vmatmul.msk.bf16.vlgmr.msrb.gmra.mxu1 %vm910_vm1, %v1220_v49  ;;  %1881 = vmatmul.msk.bf16.vlgmr.msrb.gmra.mxu2 %vm910_vm1, %v1221_v50 }
 0x305   : > { %v2059_v52 = vpop.eup %2058 }
 0x306   : > { %v1333_v54 = vmul.f32 %v2059_v52, %v2047_v17 }
 0x308   : > { %v1335_v55 = vadd.f32 %v1333_v54, %v1219_v53  ;;  %v1337_v60 = vpack.c.bf16 %v1333_v54, %v1333_v54 }
 0x30a   : > { %v1466_v56 = vmul.f32 0.25, %v1335_v55 }
 0x30c   : > { %v1468_v57 = vpack.c.bf16 %v1466_v56, %v1466_v56 }
 0x30e   : > { %v1360_v58 = vpop.permute.xlu1 %1359  ;;  %1471 = vst.msk [vmem:[%s2808_s30 + $0x4] sm:$0xf] %vm1469_vm3, %v1468_v57 }
 0x30f   : > { %v1365_v59 = vsel %vm978_vm2, %v1360_v58, 0 }
 0x310   : > { %1374 = vmatpush.bf16.msra.mxu2 %v1365_v59 }
 0x313   : > { %1885 = vmatmul.msk.bf16.vlgmr.msra.gmra.mxu2 %vm910_vm1, %v1337_v60 }
 0x316   : > { %v1339_v61 = vpop.permute.xlu1 %1338 }
 0x317   : > { %v1344_v62 = vsel %vm978_vm2, %v1339_v61, 0 }
 0x318   : > { %1353 = vmatpush.bf16.msra.mxu1 %v1344_v62 }
 0x31c   : > { %v1326_v63 = vpop.xlane.xlu0 %1325 }
 0x31d   : > { %2060 = vrcp.f32 %v1326_v63 }
 0x323   : > { %v2061_v1 = vpop.eup %2060 }
 0x324   : > { %v1332_v3 = vmul.f32 %v2061_v1, %v2049_v26 }
 0x326   : > { %v1334_v4 = vadd.f32 %v1332_v3, %v1218_v2  ;;  %v1336_v5 = vpack.c.bf16 %v1332_v3, %v1332_v3 }
 0x328   : > { %v1465_v7 = vmul.f32 0.25, %v1334_v4  ;;  %1884 = vmatmul.msk.bf16.vlgmr.msra.gmra.mxu1 %vm910_vm1, %v1336_v5 }
 0x32a   : > { %v1467_v8 = vpack.c.bf16 %v1465_v7, %v1465_v7 }
 0x32c   : > { %1470 = vst.msk [vmem:[%s2808_s30] sm:$0xf] %vm1469_vm3, %v1467_v8 }
 0x36d   : > { %v1144_v9 = vpop.f32.mrf.mxu2 }
 0x36e   : > { %v1149_v10 = vpack.c.bf16 %v1144_v9, %v1144_v9 }
 0x36f   : > { %v1120_v11 = vpop.f32.mrf.mxu1 }
 0x370   : > { %v1385_v12 = vunpack.c.l.b16 %v1149_v10  ;;  %v1148_v13 = vpack.c.bf16 %v1120_v11, %v1120_v11 }
 0x372   : > { %v1387_v14 = vpack.c.b16 %v1385_v12, %v1385_v12  ;;  %v1384_v15 = vunpack.c.l.b16 %v1148_v13 }
 0x374   : > { %v1386_v16 = vpack.c.b16 %v1384_v15, %v1384_v15  ;;  %1390 = vrot.lane.b32.xlu2 %v1387_v14, %s2407_s13 }
 0x375   : > { %v1146_v6 = vpop.f32.mrf.mxu2 }
 0x376   : > { %1388 = vrot.lane.b32.xlu1 %v1386_v16, %s2407_s13 }
 0x377   : > { %v1122_v17 = vpop.f32.mrf.mxu1 }
 0x37f   : > { %v1239_v18 = vpop.f32.mrf.mxu1 }
 0x380   : > { %v1264_v19 = vpack.c.bf16 %v1239_v18, %v1239_v18 }
 0x382   : > { %v1394_v20 = vunpack.c.l.b16 %v1264_v19 }
 0x384   : > { %v1396_v21 = vpack.c.b16 %v1394_v20, %v1394_v20 }
 0x385   : > { %v1260_v22 = vpop.f32.mrf.mxu2 }
 0x386   : > { %v1265_v23 = vpack.c.bf16 %v1260_v22, %v1260_v22  ;;  %1398 = vrot.lane.b32.xlu1 %v1396_v21, %s2408_s25 }
 0x387   : > { %v1241_v24 = vpop.f32.mrf.mxu1 }
 0x388   : > { %v1395_v25 = vunpack.c.l.b16 %v1265_v23 }
 0x38a   : > { %v1397_v26 = vpack.c.b16 %v1395_v25, %v1395_v25 }
 0x38c   : > { %1400 = vrot.lane.b32.xlu0 %v1397_v26, %s2408_s25 }
 0x38d   : > { %v1262_v27 = vpop.f32.mrf.mxu2 }
 0x396   : > { %v1376_v28 = vpop.f32.mrf.mxu2 }
 0x397   : > { %v1381_v33 = vpack.c.bf16 %v1376_v28, %v1376_v28 }
 0x399   : > { %v1405_v36 = vunpack.c.l.b16 %v1381_v33 }
 0x39b   : > { %v1407_v37 = vpack.c.b16 %v1405_v36, %v1405_v36 }
 0x39e   : > { %v1378_v29 = vpop.f32.mrf.mxu2 }
 0x3a5   : > { %v1355_v30 = vpop.f32.mrf.mxu1 }
 0x3a6   : > { %v1380_v31 = vpack.c.bf16 %v1355_v30, %v1355_v30 }
 0x3a8   : > { %v1404_v32 = vunpack.c.l.b16 %v1380_v31 }
 0x3aa   : > { %v1406_v34 = vpack.c.b16 %v1404_v32, %v1404_v32 }
 0x3ac   : > { %1408 = vrot.lane.b32.xlu1 %v1406_v34, %s2409_s18 }
 0x3ad   : > { %v1357_v35 = vpop.f32.mrf.mxu1 }
 0x3b4   : > { %1410 = vrot.lane.b32.xlu1 %v1407_v37, %s2409_s18 }
 0x3ce   : > { %v1391_v46 = vpop.permute.xlu2 %1390 }
 0x3cf   : > { %v1417_v51 = vsel %vm910_vm1, %v1015_v47, %v1391_v46 }
 0x3e8   : > { %v1389_v42 = vpop.permute.xlu1 %1388 }
 0x3e9   : > { %v1414_v48 = vsel %vm910_vm1, %v1014_v45, %v1389_v42 }
 0x3f8   : > { %v1399_v43 = vpop.permute.xlu1 %1398 }
 0x3f9   : > { %v1420_v50 = vsel %vm1418_vm4, %v1414_v48, %v1399_v43 }
 0x3fe   : > { %v1401_v49 = vpop.permute.xlu0 %1400 }
 0x3ff   : > { %v1422_v53 = vsel %vm1418_vm4, %v1417_v51, %v1401_v49 }
 0x41e   : > { %v1409_v44 = vpop.permute.xlu1 %1408 }
 0x41f   : > { %v1425_v52 = vsel %vm1423_vm5, %v1420_v50, %v1409_v44 }
 0x420   : > { %v1431_v41 = vunpack.c.l.b16 %v1425_v52 }
 0x426   : > { %v1411_v54 = vpop.permute.xlu1 %1410 }
 0x427   : > { %v1427_v55 = vsel %vm1423_vm5, %v1422_v53, %v1411_v54 }
 0x428   : > { %v1432_v56 = vunpack.c.l.b16 %v1427_v55 }
 0x42a   : > { %v1433_v57 = vpack.c.b16 %v1432_v56, %v1431_v41 }
 0x42c   : > { %1894 = vmatmul.msk.bf16.vlgmr.msra.gmra.mxu3 %vm824_vm0, %v1433_v57 }
 0x42d   : > { %2299 = shalt.err (!%p2296_p0)
}
 0x42e   : > { %s2410_s30 = smov 64   ;;  %s2411_s25 = smov 4  }
 0x42f   : > { %1935 = dma.vmem_to_hbm [thread:$0]  (%p2533_p9), %s1512_s1, 128, %s1514_s29, %s1478_s8, %s2410_s30, %s2410_s30, %s2411_s25  }
 0x430   : > { %s2958_s7 = sld [smem:[#allocation36_spill]]  ;;  %s1918_s19 = sshll.u32 %s2390_s24, 4 }
 0x431   : > { %s752_s11 = scalar_lea.vmem [#allocation14], %s2662_s0  ;;  %s2959_s3 = sld [smem:[#allocation37_spill]] }
 0x432   : > { %s1492_s1 = sshll.u32 %s752_s11, 4  ;;  %s1493_s1 = int_to_ptr.vmem [resolvable:$true] %s1492_s1 }
 0x436   : > { %s774_s17 = scalar_lea.vmem %s2958_s7, %s2692_s15  ;;  %s1473_s15 = scalar_lea.sflag [#allocation4], %s2659_s12 }
 0x437   : > { %v809_v39 = vld [vmem:[%s774_s17] sm:$0x1]  ;;  %s1491_s2 = scalar_lea.hbm %s2959_s3, %s1918_s19  ;;  %s2320_s14 = scalar_lea.hbm %s2959_s3, 32 }
 0x438   : > { %v810_v58 = vunpack.c.l.bf16 %v809_v39  ;;  %s1494_s29 = sshll.u32 %s1491_s2, 4  ;;  %s1495_s29 = int_to_ptr.hbm [resolvable:$true] %s1494_s29 }
 0x439   : > { %s2314_s8 = sshra.s32 %s1495_s29, 4  ;;  %s2315_s8 = int_to_ptr.hbm [resolvable:$true] %s2314_s8 }
 0x43a   : > { %v1428_v59 = vperm.slane %v810_v58, 0  ;;  %s2316_s24 = scalar_lea.hbm %s2315_s8, 16  ;;  %p2321_p4 = scmp.lt.s32.totalorder %s2315_s8, %s2959_s3 }
 0x43b   : > { %p2317_p1 = scmp.ne.s32.totalorder %s2315_s8, %s2316_s24  ;;  %p2322_p5 = scmp.lt.s32.totalorder %s2320_s14, %s2316_s24 }
 0x43d   : > { %p2318_p2 = pnand %p2317_p1, %p2533_p9  ;;  %p2323_p6 = por %p2322_p5, %p2321_p4 }
 0x43f   : > { %p2319_p3 = pneg %p2318_p2 }
 0x441   : > { %p2324_p7 = pnand %p2323_p6, %p2319_p3 }
 0x4af   : > { %v1458_v60 = vpop.f32.mrf.mxu3 }
 0x4b0   : > { %v1459_v61 = vadd.f32 %v1458_v60, %v1428_v59 }
 0x4b2   : > { %1463 = vst.msk [vmem:[%s752_s11] sm:$0xff] %vm824_vm0, %v1459_v61 }
 0x4b7   : > { %v1460_v62 = vpop.f32.mrf.mxu3 }
 0x4b8   : > { %v1461_v63 = vadd.f32 %v1460_v62, %v1428_v59 }
 0x4ba   : > { %1464 = vst.msk [vmem:[%s752_s11 + $0x8] sm:$0xff] %vm824_vm0, %v1461_v63 }
 0x4bb   : > { %2327 = shalt.err (!%p2324_p7)
}
 0x4bc   : > { %s2412_s12 = smov 128  }
 0x4bd   : > { %1934 = dma.vmem_to_hbm [thread:$0]  (%p2533_p9), %s1493_s1, 256, %s1495_s29, %s1473_s15, %s2412_s12, %s2412_s12, %s2407_s13  }
 0x4be PF: > { %s2960_s25 = sld [smem:[#allocation23_spill]]  ;;  %p1961_p8 = pnand %p1811_p12, %p2540_p11 }
 0x4bf   : > { %s2962_s27 = sld [smem:[#allocation25_spill]] }
 0x4c0   : > { %p1962_p10 = pneg %p1961_p8 }
 0x4c4   : > { %s1528_s7 = sand.u32 1, %s2960_s25  }
 0x4c5   : > { %s1529_s17 = scalar_lea.sflag [#allocation4], %s1528_s7 }
 0x4c6   : > { %2369 = dma.done.wait (%p1962_p10), %s1529_s17, 256  }
 0x4c7   : > { %2371 = vsyncadd (%p1962_p10), %s1529_s17, 4294967040  ;;  %s1539_s19 = scalar_lea.sflag [#allocation16], %s1528_s7 }
 0x4c8   : > { %2373 = dma.done.wait (%p1962_p10), %s1539_s19, 128  }
 0x4c9   : > { %2375 = vsyncadd (%p1962_p10), %s1539_s19, 4294967168  ;;  %s41_s26 = sadd.s32 1, %s2962_s27   ;;  %s2963_s13 = sld [smem:[#allocation28_spill]] }
 0x4ca   : > { %p38_p13 = scmp.ge.s32.totalorder %s41_s26, 4   ;;  %s2964_s24 = sld [smem:[#allocation24_spill]] }
 0x4cb   : > { %s2965_s25 = sld [smem:[#allocation26_spill]]  ;;  %s2966_s21 = smov %s2382_s22 }
 0x4cc   : > { %s2967_s22 = smov %s2386_s23  ;;  %40 = sbr.rel (!%p38_p13) target bundleno = 24 (0x18), region = 210 }
 0x4cf   : > { %s2968_s23 = smov %s2963_s13 }
 0x4d1   :  { %1545 = vsyncpa [#allocation3], 1 }
 0x4d2   :  { %1547 = vsyncpa [#allocation3 + $0x1], 1 }
 0x4d3   :  { %1548 = vsyncpa [#allocation6], 1 }
 0x4d4   :  { %1550 = vsyncpa [#allocation6 + $0x1], 1 }
 0x4d5   :  { %1551 = vsyncpa [#allocation9], 1 }
 0x4d6   :  { %1553 = vsyncpa [#allocation9 + $0x1], 1 }
 0x4d7   :  { %1554 = vsyncpa [#allocation12], 1 }
 0x4d8   :  { %1556 = vsyncpa [#allocation12 + $0x1], 1 }
 0x4d9   :  { %1557 = vsyncpa [#allocation4], 1 }
 0x4da   :  { %1559 = vsyncpa [#allocation4 + $0x1], 1 }
 0x4db   :  { %1560 = vsyncpa [#allocation16], 1 }
 0x4dc   :  { %1562 = vsyncpa [#allocation16 + $0x1], 1 }

</bundles_post_ra>
